<compile_context>
chip_gen: v7x
topology: tpu7x:2x2x1
jax: 0.10.0
libtpu: 0.0.40
codegen_flags: <defaults>
</compile_context>

<pallas_src>
import functools

import jax
import jax.numpy as jnp
from jax.experimental import pallas as pl
from jax.experimental.pallas import tpu as pltpu


def _bsage_fused_kernel(a_ref, x_ref, wl_ref, wr_ref, b_ref, o_ref, *, num_layers):
    """All SAGEConv layers fused; activations live in VMEM for the whole pass."""
    a = a_ref[...]                        # [Np, Np] f32 mean-aggregation matrix (loaded once)
    h = x_ref[...].astype(jnp.float32)    # [Np, Dp] activations (stay in VMEM)
    for i in range(num_layers):           # static unroll over layers
        agg = jnp.dot(a, h, preferred_element_type=jnp.float32)
        y = (jnp.dot(agg, wl_ref[i], preferred_element_type=jnp.float32)
             + jnp.dot(h, wr_ref[i], preferred_element_type=jnp.float32)
             + b_ref[i])                  # b_ref[i] is (1, Dp) -> broadcasts over rows
        if i < num_layers - 1:
            y = jnp.maximum(y, 0.0)       # ReLU on hidden layers; last layer is plain
        h = y
    o_ref[...] = h.astype(o_ref.dtype)


def _round_up(v, m):
    return (v + m - 1) // m * m


def bsage_forward(x, edge_index, params):
    """BSAGE forward (eval mode) with a single fused Pallas kernel.

    x: [N, in_channels] node features.
    edge_index: [2, E] int32, edge_index[0]=src, edge_index[1]=dst (message src->dst).
    params: list of (W_l [din,dout], b_l [dout], W_r [din,dout]) per layer.
    """
    n, in_dim = x.shape
    num_layers = len(params)
    out_dim = params[-1][0].shape[1]

    # Lane-dense padded width shared by all layers; node count padded once.
    d_pad = _round_up(max([in_dim] + [w.shape[1] for (w, _, _) in params]), 128)
    n_pad = _round_up(n, 128)

    # One-time feature padding (zero columns/rows never affect real outputs).
    x_pad = jnp.zeros((n_pad, d_pad), x.dtype).at[:n, :in_dim].set(x)

    # Dense row-normalized adjacency == mean aggregation over incoming edges.
    src, dst = edge_index[0], edge_index[1]
    a = jnp.zeros((n_pad, n_pad), jnp.float32).at[dst, src].add(1.0)
    deg = a.sum(axis=1, keepdims=True)
    a = a / jnp.maximum(deg, 1.0)

    # Pack (and zero-pad) all layer weights/biases into stacked arrays.
    wl = jnp.zeros((num_layers, d_pad, d_pad), jnp.float32)
    wr = jnp.zeros((num_layers, d_pad, d_pad), jnp.float32)
    b = jnp.zeros((num_layers, 1, d_pad), jnp.float32)
    for i, (wl_i, b_i, wr_i) in enumerate(params):
        di, do = wl_i.shape
        wl = wl.at[i, :di, :do].set(wl_i)
        wr = wr.at[i, :di, :do].set(wr_i)
        b = b.at[i, 0, :do].set(b_i)

    out = pl.pallas_call(
        functools.partial(_bsage_fused_kernel, num_layers=num_layers),
        out_shape=jax.ShapeDtypeStruct((n_pad, d_pad), x.dtype),
        grid_spec=pltpu.PrefetchScalarGridSpec(
            num_scalar_prefetch=0,
            grid=(1,),
            in_specs=[
                pl.BlockSpec((n_pad, n_pad), lambda i: (0, 0)),                  # A
                pl.BlockSpec((n_pad, d_pad), lambda i: (0, 0)),                  # x
                pl.BlockSpec((num_layers, d_pad, d_pad), lambda i: (0, 0, 0)),   # W_l stack
                pl.BlockSpec((num_layers, d_pad, d_pad), lambda i: (0, 0, 0)),   # W_r stack
                pl.BlockSpec((num_layers, 1, d_pad), lambda i: (0, 0, 0)),       # b stack
            ],
            out_specs=pl.BlockSpec((n_pad, d_pad), lambda i: (0, 0)),
        ),
        compiler_params=pltpu.CompilerParams(
            dimension_semantics=("arbitrary",),
        ),
    )(a, x_pad, wl, wr, b)

    return out[:n, :out_dim]


def init_bsage_params(key, num_layers, in_channels, hidden_channels, out_channels):
    """Deterministic init matching BSAGE's channel list: in -> hidden*(L-1) -> out."""
    channels = [in_channels] + [hidden_channels] * (num_layers - 1) + [out_channels]
    params = []
    for i in range(num_layers):
        key, k1, k2, k3 = jax.random.split(key, 4)
        fan_in, fan_out = channels[i], channels[i + 1]
        bound = 1.0 / jnp.sqrt(fan_in)
        wl = jax.random.uniform(k1, (fan_in, fan_out), jnp.float32, -bound, bound)
        wr = jax.random.uniform(k2, (fan_in, fan_out), jnp.float32, -bound, bound)
        b = jax.random.uniform(k3, (fan_out,), jnp.float32, -bound, bound)
        params.append((wl, b, wr))
    return params


def bsage_ref(x, edge_index, params):
    """Plain-JAX (scatter-based) reference for correctness checking."""
    src, dst = edge_index[0], edge_index[1]
    n = x.shape[0]
    num_layers = len(params)
    h = x.astype(jnp.float32)
    for i, (wl, b, wr) in enumerate(params):
        agg = jnp.zeros((n, h.shape[1]), jnp.float32).at[dst].add(h[src])
        deg = jnp.zeros((n,), jnp.float32).at[dst].add(1.0)
        agg = agg / jnp.maximum(deg, 1.0)[:, None]
        y = agg @ wl + b + h @ wr
        if i < num_layers - 1:
            y = jnp.maximum(y, 0.0)
        h = y
    return h


if __name__ == "__main__":
    # Small shapes consistent with the module: data.x is [num_nodes, in_channels],
    # data.edge_index is [2, num_edges].
    num_nodes = 256
    num_edges = 1024
    num_layers = 3
    in_channels = 16
    hidden_channels = 32
    out_channels = 8
    dropout = 0.5  # eval-mode no-op

    key = jax.random.PRNGKey(0)
    key, kx, ke = jax.random.split(key, 3)
    x = jax.random.normal(kx, (num_nodes, in_channels), jnp.float32)
    edge_index = jax.random.randint(ke, (2, num_edges), 0, num_nodes, dtype=jnp.int32)

    params = init_bsage_params(key, num_layers, in_channels, hidden_channels, out_channels)

    out = bsage_forward(x, edge_index, params)
    out = jax.block_until_ready(out)

    ref = bsage_ref(x, edge_index, params)
    assert out.shape == (num_nodes, out_channels)
    max_err = float(jnp.max(jnp.abs(out - ref)))
    assert jnp.allclose(out, ref, atol=2e-2, rtol=2e-2), f"max abs err {max_err}"

    print("KERNEL_OK")
</pallas_src>

<mosaic_0001>
module attributes {stable_mosaic.version = 11 : i64} {
  func.func @_bsage_fused_kernel(%arg0: i32, %arg1: memref<256x256xf32, #tpu.memory_space<vmem>>, %arg2: memref<256x128xf32, #tpu.memory_space<vmem>>, %arg3: memref<3x128x128xf32, #tpu.memory_space<vmem>>, %arg4: memref<3x128x128xf32, #tpu.memory_space<vmem>>, %arg5: memref<3x1x128xf32, #tpu.memory_space<vmem>>, %arg6: memref<256x128xf32, #tpu.memory_space<vmem>>) attributes {dimension_semantics = [#tpu.dimension_semantics<arbitrary>], iteration_bounds = array<i64: 1>, scalar_prefetch = 0 : i64, scratch_operands = 0 : i64, tpu.core_type = #tpu.core_type<tc>, window_params = [{pipeline_mode = #tpu.pipeline_mode<synchronous>, transform_indices = @transform_0, window_bounds = array<i64: 256, 256>}, {pipeline_mode = #tpu.pipeline_mode<synchronous>, transform_indices = @transform_1, window_bounds = array<i64: 256, 128>}, {pipeline_mode = #tpu.pipeline_mode<synchronous>, transform_indices = @transform_2, window_bounds = array<i64: 3, 128, 128>}, {pipeline_mode = #tpu.pipeline_mode<synchronous>, transform_indices = @transform_3, window_bounds = array<i64: 3, 128, 128>}, {pipeline_mode = #tpu.pipeline_mode<synchronous>, transform_indices = @transform_4, window_bounds = array<i64: 3, 1, 128>}, {pipeline_mode = #tpu.pipeline_mode<synchronous>, transform_indices = @transform_5, window_bounds = array<i64: 256, 128>}]} {
    %c0 = arith.constant 0 : index
    %c0_0 = arith.constant 0 : index
    %0 = vector.load %arg1[%c0, %c0_0] : memref<256x256xf32, #tpu.memory_space<vmem>>, vector<256x256xf32>
    %c0_1 = arith.constant 0 : index
    %c0_2 = arith.constant 0 : index
    %1 = vector.load %arg2[%c0_1, %c0_2] : memref<256x128xf32, #tpu.memory_space<vmem>>, vector<256x128xf32>
    %cst = arith.constant dense<0.000000e+00> : vector<256x128xf32>
    %2 = tpu.matmul %0, %1, %cst {dimension_numbers = #tpu.dot_dimension_numbers<[1], [0], [0], [1], [0, 0, 1, 1], [], []>} : vector<256x256xf32>, vector<256x128xf32>, vector<256x128xf32> -> vector<256x128xf32>
    %c0_3 = arith.constant 0 : index
    %c0_4 = arith.constant 0 : index
    %c0_5 = arith.constant 0 : index
    %3 = vector.load %arg3[%c0_3, %c0_4, %c0_5] : memref<3x128x128xf32, #tpu.memory_space<vmem>>, vector<1x128x128xf32>
    %4 = vector.shape_cast %3 : vector<1x128x128xf32> to vector<128x128xf32>
    %cst_6 = arith.constant dense<0.000000e+00> : vector<256x128xf32>
    %5 = tpu.matmul %2, %4, %cst_6 {dimension_numbers = #tpu.dot_dimension_numbers<[1], [0], [0], [1], [0, 0, 1, 1], [], []>} : vector<256x128xf32>, vector<128x128xf32>, vector<256x128xf32> -> vector<256x128xf32>
    %c0_7 = arith.constant 0 : index
    %c0_8 = arith.constant 0 : index
    %c0_9 = arith.constant 0 : index
    %6 = vector.load %arg4[%c0_7, %c0_8, %c0_9] : memref<3x128x128xf32, #tpu.memory_space<vmem>>, vector<1x128x128xf32>
    %7 = vector.shape_cast %6 : vector<1x128x128xf32> to vector<128x128xf32>
    %cst_10 = arith.constant dense<0.000000e+00> : vector<256x128xf32>
    %8 = tpu.matmul %1, %7, %cst_10 {dimension_numbers = #tpu.dot_dimension_numbers<[1], [0], [0], [1], [0, 0, 1, 1], [], []>} : vector<256x128xf32>, vector<128x128xf32>, vector<256x128xf32> -> vector<256x128xf32>
    %9 = arith.addf %5, %8 : vector<256x128xf32>
    %c0_11 = arith.constant 0 : index
    %c0_12 = arith.constant 0 : index
    %c0_13 = arith.constant 0 : index
    %10 = vector.load %arg5[%c0_11, %c0_12, %c0_13] : memref<3x1x128xf32, #tpu.memory_space<vmem>>, vector<1x1x128xf32>
    %11 = vector.shape_cast %10 : vector<1x1x128xf32> to vector<1x128xf32>
    %12 = vector.broadcast %11 : vector<1x128xf32> to vector<256x128xf32>
    %13 = arith.addf %9, %12 : vector<256x128xf32>
    %cst_14 = arith.constant 0.000000e+00 : f32
    %14 = vector.broadcast %cst_14 : f32 to vector<256x128xf32>
    %15 = arith.maximumf %13, %14 : vector<256x128xf32>
    %cst_15 = arith.constant dense<0.000000e+00> : vector<256x128xf32>
    %16 = tpu.matmul %0, %15, %cst_15 {dimension_numbers = #tpu.dot_dimension_numbers<[1], [0], [0], [1], [0, 0, 1, 1], [], []>} : vector<256x256xf32>, vector<256x128xf32>, vector<256x128xf32> -> vector<256x128xf32>
    %c1 = arith.constant 1 : index
    %c0_16 = arith.constant 0 : index
    %c0_17 = arith.constant 0 : index
    %17 = vector.load %arg3[%c1, %c0_16, %c0_17] : memref<3x128x128xf32, #tpu.memory_space<vmem>>, vector<1x128x128xf32>
    %18 = vector.shape_cast %17 : vector<1x128x128xf32> to vector<128x128xf32>
    %cst_18 = arith.constant dense<0.000000e+00> : vector<256x128xf32>
    %19 = tpu.matmul %16, %18, %cst_18 {dimension_numbers = #tpu.dot_dimension_numbers<[1], [0], [0], [1], [0, 0, 1, 1], [], []>} : vector<256x128xf32>, vector<128x128xf32>, vector<256x128xf32> -> vector<256x128xf32>
    %c1_19 = arith.constant 1 : index
    %c0_20 = arith.constant 0 : index
    %c0_21 = arith.constant 0 : index
    %20 = vector.load %arg4[%c1_19, %c0_20, %c0_21] : memref<3x128x128xf32, #tpu.memory_space<vmem>>, vector<1x128x128xf32>
    %21 = vector.shape_cast %20 : vector<1x128x128xf32> to vector<128x128xf32>
    %cst_22 = arith.constant dense<0.000000e+00> : vector<256x128xf32>
    %22 = tpu.matmul %15, %21, %cst_22 {dimension_numbers = #tpu.dot_dimension_numbers<[1], [0], [0], [1], [0, 0, 1, 1], [], []>} : vector<256x128xf32>, vector<128x128xf32>, vector<256x128xf32> -> vector<256x128xf32>
    %23 = arith.addf %19, %22 : vector<256x128xf32>
    %c1_23 = arith.constant 1 : index
    %c0_24 = arith.constant 0 : index
    %c0_25 = arith.constant 0 : index
    %24 = vector.load %arg5[%c1_23, %c0_24, %c0_25] : memref<3x1x128xf32, #tpu.memory_space<vmem>>, vector<1x1x128xf32>
    %25 = vector.shape_cast %24 : vector<1x1x128xf32> to vector<1x128xf32>
    %26 = vector.broadcast %25 : vector<1x128xf32> to vector<256x128xf32>
    %27 = arith.addf %23, %26 : vector<256x128xf32>
    %cst_26 = arith.constant 0.000000e+00 : f32
    %28 = vector.broadcast %cst_26 : f32 to vector<256x128xf32>
    %29 = arith.maximumf %27, %28 : vector<256x128xf32>
    %cst_27 = arith.constant dense<0.000000e+00> : vector<256x128xf32>
    %30 = tpu.matmul %0, %29, %cst_27 {dimension_numbers = #tpu.dot_dimension_numbers<[1], [0], [0], [1], [0, 0, 1, 1], [], []>} : vector<256x256xf32>, vector<256x128xf32>, vector<256x128xf32> -> vector<256x128xf32>
    %c2 = arith.constant 2 : index
    %c0_28 = arith.constant 0 : index
    %c0_29 = arith.constant 0 : index
    %31 = vector.load %arg3[%c2, %c0_28, %c0_29] : memref<3x128x128xf32, #tpu.memory_space<vmem>>, vector<1x128x128xf32>
    %32 = vector.shape_cast %31 : vector<1x128x128xf32> to vector<128x128xf32>
    %cst_30 = arith.constant dense<0.000000e+00> : vector<256x128xf32>
    %33 = tpu.matmul %30, %32, %cst_30 {dimension_numbers = #tpu.dot_dimension_numbers<[1], [0], [0], [1], [0, 0, 1, 1], [], []>} : vector<256x128xf32>, vector<128x128xf32>, vector<256x128xf32> -> vector<256x128xf32>
    %c2_31 = arith.constant 2 : index
    %c0_32 = arith.constant 0 : index
    %c0_33 = arith.constant 0 : index
    %34 = vector.load %arg4[%c2_31, %c0_32, %c0_33] : memref<3x128x128xf32, #tpu.memory_space<vmem>>, vector<1x128x128xf32>
    %35 = vector.shape_cast %34 : vector<1x128x128xf32> to vector<128x128xf32>
    %cst_34 = arith.constant dense<0.000000e+00> : vector<256x128xf32>
    %36 = tpu.matmul %29, %35, %cst_34 {dimension_numbers = #tpu.dot_dimension_numbers<[1], [0], [0], [1], [0, 0, 1, 1], [], []>} : vector<256x128xf32>, vector<128x128xf32>, vector<256x128xf32> -> vector<256x128xf32>
    %37 = arith.addf %33, %36 : vector<256x128xf32>
    %c2_35 = arith.constant 2 : index
    %c0_36 = arith.constant 0 : index
    %c0_37 = arith.constant 0 : index
    %38 = vector.load %arg5[%c2_35, %c0_36, %c0_37] : memref<3x1x128xf32, #tpu.memory_space<vmem>>, vector<1x1x128xf32>
    %39 = vector.shape_cast %38 : vector<1x1x128xf32> to vector<1x128xf32>
    %40 = vector.broadcast %39 : vector<1x128xf32> to vector<256x128xf32>
    %41 = arith.addf %37, %40 : vector<256x128xf32>
    %c0_38 = arith.constant 0 : index
    %c0_39 = arith.constant 0 : index
    %42 = vector.load %arg6[%c0_38, %c0_39] : memref<256x128xf32, #tpu.memory_space<vmem>>, vector<256x128xf32>
    tpu.vector_store %arg6[%c0_38, %c0_39], %41 {strides = array<i32>} : memref<256x128xf32, #tpu.memory_space<vmem>>, vector<256x128xf32>,
    return
  }
  func.func @transform_0(%arg0: i32) -> (i32, i32) {
    %c0_i32 = arith.constant 0 : i32
    %c0_i32_0 = arith.constant 0 : i32
    %c0_i32_1 = arith.constant 0 : i32
    return %c0_i32, %c0_i32_0 : i32, i32
  }
  func.func @transform_1(%arg0: i32) -> (i32, i32) {
    %c0_i32 = arith.constant 0 : i32
    %c0_i32_0 = arith.constant 0 : i32
    %c0_i32_1 = arith.constant 0 : i32
    return %c0_i32, %c0_i32_0 : i32, i32
  }
  func.func @transform_2(%arg0: i32) -> (i32, i32, i32) {
    %c0_i32 = arith.constant 0 : i32
    %c0_i32_0 = arith.constant 0 : i32
    %c0_i32_1 = arith.constant 0 : i32
    %c0_i32_2 = arith.constant 0 : i32
    return %c0_i32, %c0_i32_0, %c0_i32_1 : i32, i32, i32
  }
  func.func @transform_3(%arg0: i32) -> (i32, i32, i32) {
    %c0_i32 = arith.constant 0 : i32
    %c0_i32_0 = arith.constant 0 : i32
    %c0_i32_1 = arith.constant 0 : i32
    %c0_i32_2 = arith.constant 0 : i32
    return %c0_i32, %c0_i32_0, %c0_i32_1 : i32, i32, i32
  }
  func.func @transform_4(%arg0: i32) -> (i32, i32, i32) {
    %c0_i32 = arith.constant 0 : i32
    %c0_i32_0 = arith.constant 0 : i32
    %c0_i32_1 = arith.constant 0 : i32
    %c0_i32_2 = arith.constant 0 : i32
    return %c0_i32, %c0_i32_0, %c0_i32_1 : i32, i32, i32
  }
  func.func @transform_5(%arg0: i32) -> (i32, i32) {
    %c0_i32 = arith.constant 0 : i32
    %c0_i32_0 = arith.constant 0 : i32
    %c0_i32_1 = arith.constant 0 : i32
    return %c0_i32, %c0_i32_0 : i32, i32
  }
}

</mosaic_0001>

<bundles_post_ra>
// kernel: tpu_custom_call.1
= control target key start
LH: loop header
LB: loop body
LE: loop exit
PB: predicated region body
PF: predicated region fallthrough
CT: control target
= control target key end

     0   :  { %10 = vsyncpa [#allocation3], 0  ;;  %s4730_s0 = inlined_call_operand.hbm [shape: f32[256,256], index: 0, kind: input, shape index: {}]   ;;  %s4731_s1 = inlined_call_operand.hbm [shape: f32[256,128], index: 1, kind: input, shape index: {}]   ;;  %s4732_s2 = inlined_call_operand.hbm [shape: f32[3,128,128], index: 2, kind: input, shape index: {}]   ;;  %s4733_s3 = inlined_call_operand.hbm [shape: f32[3,128,128], index: 3, kind: input, shape index: {}]   ;;  %s4734_s4 = inlined_call_operand.vmem [shape: f32[3,1,128], index: 4, kind: input, shape index: {}]   ;;  %s4735_s5 = inlined_call_operand.hbm [shape: f32[256,128], index: 5, kind: output, shape index: {}]  }
   0x1   :  { %11 = vsyncpa [#allocation6], 0 }
   0x2   :  { %12 = vsyncpa [#allocation9], 0 }
   0x3   :  { %13 = vsyncpa [#allocation4], 0  ;;  %s3944_s18 = smov [#allocation5]   ;;  %s3826_s22 = scalar_lea.hbm %s4731_s1, 4096 }
   0x4   :  { %s31_s19 = sshll.u32 %s3944_s18, 4  ;;  %p3827_p0 = scmp.ne.s32.totalorder %s4731_s1, %s3826_s22  ;;  %s32_s19 = int_to_ptr.vmem [resolvable:$true] %s31_s19 }
   0x5   :  { %p3830_p1 = scmp.lt.u32.totalorder %s3826_s22, %s4731_s1 }
   0x7   :  { %p3832_p2 = pnand %p3830_p1, %p3827_p0 }
   0x9   :  { %3835 = shalt.err (!%p3832_p2)
}
   0xa   :  { %s3836_s27 = scalar_lea.vmem %s32_s19, 4096  ;;  %p3841_p4 = scmp.lt.s32.totalorder %s32_s19, %s32_s19 }
   0xb   :  { %p3837_p3 = scmp.ne.s32.totalorder %s32_s19, %s3836_s27  ;;  %p3842_p5 = scmp.lt.s32.totalorder %s3836_s27, %s3836_s27 }
   0xd   :  { %p3843_p6 = por %p3842_p5, %p3841_p4 }
   0xf   :  { %p3844_p7 = pnand %p3843_p6, %p3837_p3 }
  0x11   :  { %3847 = shalt.err (!%p3844_p7)
}
  0x12   :  { %s3945_s28 = smov 128   ;;  %s3946_s29 = smov 8  }
  0x13   :  { %37 = dma.hbm_to_vmem [thread:$0]  %s4731_s1, 4096, %s32_s19, [#allocation6], %s3945_s28, %s3945_s28, %s3946_s29  }
  0x14   :  { %s3947_s7 = smov [#allocation2]   ;;  %s3848_s11 = scalar_lea.hbm %s4730_s0, 8192 }
  0x15   :  { %s19_s8 = sshll.u32 %s3947_s7, 4  ;;  %p3849_p8 = scmp.ne.s32.totalorder %s4730_s0, %s3848_s11  ;;  %s20_s8 = int_to_ptr.vmem [resolvable:$true] %s19_s8 }
  0x16   :  { %p3852_p9 = scmp.lt.u32.totalorder %s3848_s11, %s4730_s0 }
  0x18   :  { %p3854_p10 = pnand %p3852_p9, %p3849_p8 }
  0x1a   :  { %3857 = shalt.err (!%p3854_p10)
}
  0x1b   :  { %s3858_s16 = scalar_lea.vmem %s20_s8, 8192  ;;  %p3863_p12 = scmp.lt.s32.totalorder %s20_s8, %s20_s8 }
  0x1c   :  { %p3859_p11 = scmp.ne.s32.totalorder %s20_s8, %s3858_s16  ;;  %p3864_p13 = scmp.lt.s32.totalorder %s3858_s16, %s3858_s16 }
  0x1e   :  { %p3865_p0 = por %p3864_p13, %p3863_p12 }
  0x20   :  { %p3866_p1 = pnand %p3865_p0, %p3859_p11 }
  0x22   :  { %3869 = shalt.err (!%p3866_p1)
}
  0x23   :  { %s3948_s1 = smov 256   ;;  %s3949_s17 = smov 16  }
  0x24   :  { %25 = dma.hbm_to_vmem [thread:$0]  %s4730_s0, 8192, %s20_s8, [#allocation3], %s3948_s1, %s3948_s1, %s3949_s17  }
  0x25   :  { %s3950_s20 = smov [#allocation7]   ;;  %s3951_s22 = smov [#allocation8]  }
  0x26   :  { %s43_s21 = sshll.u32 %s3950_s20, 4  ;;  %s55_s23 = sshll.u32 %s3951_s22, 4  ;;  %s44_s21 = int_to_ptr.vmem [resolvable:$true] %s43_s21  ;;  %s4011_s23 = int_to_ptr.vmem [resolvable:$true] %s55_s23 }
  0x27   :  { %s3870_s26 = scalar_lea.hbm %s4732_s2, 6144 }
  0x28   :  { %p3871_p2 = scmp.ne.s32.totalorder %s4732_s2, %s3870_s26  ;;  %p3874_p3 = scmp.lt.u32.totalorder %s3870_s26, %s4732_s2 }
  0x2a   :  { %p3876_p4 = pnand %p3874_p3, %p3871_p2 }
  0x2c   :  { %3879 = shalt.err (!%p3876_p4)
}
  0x2d   :  { %s3880_s0 = scalar_lea.vmem %s44_s21, 6144  ;;  %p3885_p6 = scmp.lt.s32.totalorder %s44_s21, %s44_s21 }
  0x2e   :  { %p3881_p5 = scmp.ne.s32.totalorder %s44_s21, %s3880_s0  ;;  %p3886_p7 = scmp.lt.s32.totalorder %s3880_s0, %s3880_s0 }
  0x30   :  { %p3887_p8 = por %p3886_p7, %p3885_p6 }
  0x32   :  { %p3888_p9 = pnand %p3887_p8, %p3881_p5 }
  0x34   :  { %3891 = shalt.err (!%p3888_p9)
}
  0x35   :  { %49 = dma.hbm_to_vmem [thread:$0]  %s4732_s2, 6144, %s44_s21, [#allocation6], %s3945_s28, %s3945_s28, %s3946_s29  }
  0x36   :  { %s3892_s12 = scalar_lea.hbm %s4733_s3, 6144 }
  0x37   :  { %p3893_p10 = scmp.ne.s32.totalorder %s4733_s3, %s3892_s12  ;;  %p3896_p11 = scmp.lt.u32.totalorder %s3892_s12, %s4733_s3 }
  0x39   :  { %p3898_p12 = pnand %p3896_p11, %p3893_p10 }
  0x3b   :  { %3901 = shalt.err (!%p3898_p12)
}
  0x3c   :  { %s3902_s1 = scalar_lea.vmem %s4011_s23, 6144  ;;  %p3907_p0 = scmp.lt.s32.totalorder %s4011_s23, %s4011_s23 }
  0x3d   :  { %p3903_p13 = scmp.ne.s32.totalorder %s4011_s23, %s3902_s1  ;;  %p3908_p1 = scmp.lt.s32.totalorder %s3902_s1, %s3902_s1 }
  0x3f   :  { %p3909_p2 = por %p3908_p1, %p3907_p0 }
  0x41   :  { %p3910_p3 = pnand %p3909_p2, %p3903_p13 }
  0x43   :  { %3913 = shalt.err (!%p3910_p3)
}
  0x44   :  { %61 = dma.hbm_to_vmem [thread:$0]  %s4733_s3, 6144, %s4011_s23, [#allocation9], %s3945_s28, %s3945_s28, %s3946_s29  }
  0x45   :  { %3936 = dma.done.wait [#allocation3], 8192  }
  0x46   :  { %3937 = vsyncadd [#allocation3], 4294959104 }
  0x47   :  { %3938 = dma.done.wait [#allocation6], 10240  }
  0x48   :  { %3939 = vsyncadd [#allocation6], 4294957056 }
  0x49   :  { %3940 = dma.done.wait [#allocation9], 6144  }
  0x4a   :  { %3941 = vsyncadd [#allocation9], 4294961152  ;;  %v4736_v0 = vmov 0.0|0.0   ;;  %v140_v1 = vld [vmem:[#allocation5] sm:$0xff]  ;;  %v4049_v2 = vld [vmem:[#allocation5 + $0x8] sm:$0xff] }
  0x4b   :  { %3304 = vmatprep.subr.bf16.mxu0 %v4736_v0  ;;  %v4051_v3 = vld [vmem:[#allocation5 + $0x10] sm:$0xff]  ;;  %v3305_v4 = vpack.c.bf16 %v4049_v2, %v140_v1  ;;  %v4054_v5 = vld [vmem:[#allocation5 + $0x18] sm:$0xff]  ;;  %2856 = vmatprep.mubr.f32.mxu1 %v140_v1  ;;  %v4059_v7 = vld [vmem:[#allocation5 + $0x20] sm:$0xff] }
  0x4c   :  { %v3308_v6 = vpack.c.bf16 %v4054_v5, %v4051_v3  ;;  %v4061_v8 = vld [vmem:[#allocation5 + $0x28] sm:$0xff]  ;;  %v4066_v10 = vld [vmem:[#allocation5 + $0x30] sm:$0xff]  ;;  %v4068_v11 = vld [vmem:[#allocation5 + $0x38] sm:$0xff] }
  0x4d   :  { %3306 = vmatpush1.bf16.msra.mxu0 %v3305_v4  ;;  %v3311_v9 = vpack.c.bf16 %v4061_v8, %v4059_v7  ;;  %v4070_v12 = vld [vmem:[#allocation2 + $0x8] sm:$0xff]  ;;  %v3314_v13 = vpack.c.bf16 %v4068_v11, %v4066_v10  ;;  %v4076_v14 = vld [vmem:[#allocation5 + $0x40] sm:$0xff]  ;;  %v4083_v17 = vld [vmem:[#allocation5 + $0x50] sm:$0xff] }
  0x4e   :  { %3307 = vmatprep.subr.bf16.mxu0 %v4736_v0  ;;  %236 = vmatprep.mubr.f32.mxu0 %v4070_v12  ;;  %v4078_v15 = vld [vmem:[#allocation5 + $0x48] sm:$0xff]  ;;  %v4085_v18 = vld [vmem:[#allocation5 + $0x58] sm:$0xff]  ;;  %v4090_v20 = vld [vmem:[#allocation5 + $0x60] sm:$0xff] }
  0x4f   :  { %v3317_v16 = vpack.c.bf16 %v4078_v15, %v4076_v14  ;;  %v3320_v19 = vpack.c.bf16 %v4085_v18, %v4083_v17  ;;  %v4092_v21 = vld [vmem:[#allocation5 + $0x68] sm:$0xff]  ;;  %v4097_v23 = vld [vmem:[#allocation5 + $0x70] sm:$0xff]  ;;  %v4099_v24 = vld [vmem:[#allocation5 + $0x78] sm:$0xff] }
  0x50   :  { %v3323_v22 = vpack.c.bf16 %v4092_v21, %v4090_v20  ;;  %v3326_v25 = vpack.c.bf16 %v4099_v24, %v4097_v23  ;;  %v4104_v26 = vld [vmem:[#allocation5 + $0x80] sm:$0xff]  ;;  %v4106_v27 = vld [vmem:[#allocation5 + $0x88] sm:$0xff]  ;;  %v4111_v29 = vld [vmem:[#allocation5 + $0x90] sm:$0xff] }
  0x51   :  { %3309 = vmatpush1.bf16.msra.mxu0 %v3308_v6  ;;  %v3329_v28 = vpack.c.bf16 %v4106_v27, %v4104_v26  ;;  %v4113_v30 = vld [vmem:[#allocation5 + $0x98] sm:$0xff]  ;;  %v4118_v32 = vld [vmem:[#allocation5 + $0xa0] sm:$0xff]  ;;  %v4120_v33 = vld [vmem:[#allocation5 + $0xa8] sm:$0xff] }
  0x52   :  { %3310 = vmatprep.subr.bf16.mxu0 %v4736_v0  ;;  %v3332_v31 = vpack.c.bf16 %v4113_v30, %v4111_v29  ;;  %v3335_v34 = vpack.c.bf16 %v4120_v33, %v4118_v32  ;;  %v4125_v35 = vld [vmem:[#allocation5 + $0xb0] sm:$0xff]  ;;  %v4127_v36 = vld [vmem:[#allocation5 + $0xb8] sm:$0xff]  ;;  %v4132_v38 = vld [vmem:[#allocation5 + $0xc0] sm:$0xff] }
  0x53   :  { %v3338_v37 = vpack.c.bf16 %v4127_v36, %v4125_v35  ;;  %v4134_v39 = vld [vmem:[#allocation5 + $0xc8] sm:$0xff]  ;;  %v4139_v41 = vld [vmem:[#allocation5 + $0xd0] sm:$0xff]  ;;  %v4141_v42 = vld [vmem:[#allocation5 + $0xd8] sm:$0xff] }
  0x54   :  { %v3341_v40 = vpack.c.bf16 %v4134_v39, %v4132_v38  ;;  %v3344_v43 = vpack.c.bf16 %v4141_v42, %v4139_v41  ;;  %v4146_v44 = vld [vmem:[#allocation5 + $0xe0] sm:$0xff]  ;;  %v4148_v45 = vld [vmem:[#allocation5 + $0xe8] sm:$0xff]  ;;  %v4153_v50 = vld [vmem:[#allocation5 + $0xf0] sm:$0xff] }
  0x55   :  { %3312 = vmatpush1.bf16.msra.mxu0 %v3311_v9  ;;  %v413_v46 = vld [vmem:[#allocation8] sm:$0xff]  ;;  %v414_v47 = vld [vmem:[#allocation8 + $0x8] sm:$0xff]  ;;  %v3347_v48 = vpack.c.bf16 %v4148_v45, %v4146_v44  ;;  %v4155_v51 = vld [vmem:[#allocation5 + $0xf8] sm:$0xff] }
  0x56   :  { %3313 = vmatprep.subr.bf16.mxu0 %v4736_v0  ;;  %v3352_v49 = vpack.c.bf16 %v414_v47, %v413_v46  ;;  %v415_v52 = vld [vmem:[#allocation8 + $0x10] sm:$0xff]  ;;  %v416_v53 = vld [vmem:[#allocation8 + $0x18] sm:$0xff]  ;;  %v3350_v54 = vpack.c.bf16 %v4155_v51, %v4153_v50  ;;  %v417_v56 = vld [vmem:[#allocation8 + $0x20] sm:$0xff] }
  0x57   :  { %v3356_v55 = vpack.c.bf16 %v416_v53, %v415_v52  ;;  %v418_v57 = vld [vmem:[#allocation8 + $0x28] sm:$0xff]  ;;  %v419_v58 = vld [vmem:[#allocation8 + $0x30] sm:$0xff]  ;;  %v76_v59 = vld [vmem:[#allocation2] sm:$0xff] }
  0x58   :  { %3353 = vmatprep.subr.bf16.mxu1 %v3352_v49  ;;  %v3360_v60 = vpack.c.bf16 %v418_v57, %v417_v56  ;;  %v420_v61 = vld [vmem:[#allocation8 + $0x38] sm:$0xff]  ;;  %v421_v1 = vld [vmem:[#allocation8 + $0x40] sm:$0xff]  ;;  %v422_v4 = vld [vmem:[#allocation8 + $0x48] sm:$0xff] }
  0x59   :  { %3315 = vmatpush1.bf16.msra.mxu0 %v3314_v13  ;;  %3355 = vmatpush3.bf16.msra.mxu1 %v3352_v49  ;;  %v79_v62 = vld [vmem:[#allocation2 + $0x18] sm:$0xff]  ;;  %v3364_v63 = vpack.c.bf16 %v420_v61, %v419_v58  ;;  %v78_v6 = vld [vmem:[#allocation2 + $0x10] sm:$0xff]  ;;  %v3368_v9 = vpack.c.bf16 %v422_v4, %v421_v1  ;;  %v81_v13 = vld [vmem:[#allocation2 + $0x28] sm:$0xff] }
  0x5a   :  { %3316 = vmatprep.subr.bf16.mxu0 %v4736_v0  ;;  %3357 = vmatprep.subr.bf16.mxu1 %v3356_v55  ;;  %v427_v46 = vld [vmem:[#allocation8 + $0x70] sm:$0xff]  ;;  %v428_v47 = vld [vmem:[#allocation8 + $0x78] sm:$0xff]  ;;  %v397_v53 = vld [vmem:[#allocation7] sm:$0xff] }
  0x5b   :  { %v3380_v49 = vpack.c.bf16 %v428_v47, %v427_v46  ;;  %v87_v52 = vld [vmem:[#allocation2 + $0x58] sm:$0xff]  ;;  %v89_v57 = vld [vmem:[#allocation2 + $0x68] sm:$0xff]  ;;  %v399_v58 = vld [vmem:[#allocation7 + $0x10] sm:$0xff] }
  0x5c   :  { %v91_v61 = vld [vmem:[#allocation2 + $0x78] sm:$0xff]  ;;  %v402_v1 = vld [vmem:[#allocation7 + $0x28] sm:$0xff]  ;;  %v90_v4 = vld [vmem:[#allocation2 + $0x70] sm:$0xff] }
  0x5d   :  { %3318 = vmatpush1.bf16.msra.mxu0 %v3317_v16  ;;  %3359 = vmatpush3.bf16.msra.mxu1 %v3356_v55  ;;  %v423_v16 = vld [vmem:[#allocation8 + $0x50] sm:$0xff]  ;;  %v4208_v47 = vld [vmem:[#allocation2 + $0xf8] sm:$0xff] }
  0x5e   :  { %3319 = vmatprep.subr.bf16.mxu0 %v4736_v0  ;;  %3361 = vmatprep.subr.bf16.mxu1 %v3360_v60  ;;  %v86_v55 = vld [vmem:[#allocation2 + $0x50] sm:$0xff] }
  0x61   :  { %3321 = vmatpush1.bf16.msra.mxu0 %v3320_v19  ;;  %3363 = vmatpush3.bf16.msra.mxu1 %v3360_v60  ;;  %v424_v19 = vld [vmem:[#allocation8 + $0x58] sm:$0xff]  ;;  %v88_v60 = vld [vmem:[#allocation2 + $0x60] sm:$0xff] }
  0x62   :  { %3322 = vmatprep.subr.bf16.mxu0 %v4736_v0  ;;  %3365 = vmatprep.subr.bf16.mxu1 %v3364_v63 }
  0x65   :  { %3324 = vmatpush1.bf16.msra.mxu0 %v3323_v22  ;;  %3367 = vmatpush3.bf16.msra.mxu1 %v3364_v63  ;;  %v80_v22 = vld [vmem:[#allocation2 + $0x20] sm:$0xff] }
  0x66   :  { %3325 = vmatprep.subr.bf16.mxu0 %v4736_v0  ;;  %3369 = vmatprep.subr.bf16.mxu1 %v3368_v9  ;;  %v401_v63 = vld [vmem:[#allocation7 + $0x20] sm:$0xff] }
  0x69   :  { %3327 = vmatpush1.bf16.msra.mxu0 %v3326_v25  ;;  %v3372_v25 = vpack.c.bf16 %v424_v19, %v423_v16  ;;  %3371 = vmatpush3.bf16.msra.mxu1 %v3368_v9  ;;  %v3392_v9 = vpack.c.bf16 %v402_v1, %v401_v63  ;;  %v404_v16 = vld [vmem:[#allocation7 + $0x38] sm:$0xff]  ;;  %v4312_v63 = vld [vmem:[#allocation2 + $0x1d0] sm:$0xff]  ;;  %v4314_v1 = vld [vmem:[#allocation2 + $0x1e8] sm:$0xff] }
  0x6a   :  { %3328 = vmatprep.subr.bf16.mxu0 %v4736_v0  ;;  %v95_v19 = vld [vmem:[#allocation2 + $0x98] sm:$0xff] }
  0x6b   :  { %3373 = vmatprep.subr.bf16.mxu1 %v3372_v25 }
  0x6d   :  { %3330 = vmatpush1.bf16.msra.mxu0 %v3329_v28  ;;  %v83_v28 = vld [vmem:[#allocation2 + $0x38] sm:$0xff]  ;;  %3375 = vmatpush3.bf16.msra.mxu1 %v3372_v25  ;;  %v406_v25 = vld [vmem:[#allocation7 + $0x48] sm:$0xff] }
  0x6e   :  { %3331 = vmatprep.subr.bf16.mxu0 %v4736_v0 }
  0x71   :  { %3333 = vmatpush1.bf16.msra.mxu0 %v3332_v31  ;;  %v425_v31 = vld [vmem:[#allocation8 + $0x60] sm:$0xff] }
  0x72   :  { %3334 = vmatprep.subr.bf16.mxu0 %v4736_v0 }
  0x75   :  { %3336 = vmatpush1.bf16.msra.mxu0 %v3335_v34  ;;  %v426_v34 = vld [vmem:[#allocation8 + $0x68] sm:$0xff] }
  0x76   :  { %3337 = vmatprep.subr.bf16.mxu0 %v4736_v0 }
  0x79   :  { %3339 = vmatpush1.bf16.msra.mxu0 %v3338_v37  ;;  %v82_v37 = vld [vmem:[#allocation2 + $0x30] sm:$0xff] }
  0x7a   :  { %3340 = vmatprep.subr.bf16.mxu0 %v4736_v0 }
  0x7d   :  { %3342 = vmatpush1.bf16.msra.mxu0 %v3341_v40  ;;  %v3376_v40 = vpack.c.bf16 %v426_v34, %v425_v31  ;;  %v407_v31 = vld [vmem:[#allocation7 + $0x50] sm:$0xff]  ;;  %v408_v34 = vld [vmem:[#allocation7 + $0x58] sm:$0xff] }
  0x7e   :  { %3343 = vmatprep.subr.bf16.mxu0 %v4736_v0 }
  0x7f   :  { %3377 = vmatprep.subr.bf16.mxu1 %v3376_v40 }
  0x80   :  { %3379 = vmatpush3.bf16.msra.mxu1 %v3376_v40  ;;  %v409_v40 = vld [vmem:[#allocation7 + $0x60] sm:$0xff] }
  0x81   :  { %3345 = vmatpush1.bf16.msra.mxu0 %v3344_v43  ;;  %v85_v43 = vld [vmem:[#allocation2 + $0x48] sm:$0xff]  ;;  %3381 = vmatprep.subr.bf16.mxu1 %v3380_v49 }
  0x82   :  { %3346 = vmatprep.subr.bf16.mxu0 %v4736_v0 }
  0x84   :  { %3383 = vmatpush3.bf16.msra.mxu1 %v3380_v49  ;;  %v4264_v49 = vld [vmem:[#allocation2 + $0x168] sm:$0xff] }
  0x85   :  { %3348 = vmatpush1.bf16.msra.mxu0 %v3347_v48  ;;  %v84_v48 = vld [vmem:[#allocation2 + $0x40] sm:$0xff] }
  0x86   :  { %3349 = vmatprep.subr.bf16.mxu0 %v4736_v0 }
  0x87   :  { %2857 = vmatmul.mubr.f32.vlgmr.msra.gmra.mrb[0].mxu1 %v4049_v2  ;;  %v92_v2 = vld [vmem:[#allocation2 + $0x80] sm:$0xff] }
  0x88   :  { %2859 = vmatprep.mubr.f32.mxu1 %v4051_v3  ;;  %v405_v3 = vld [vmem:[#allocation7 + $0x40] sm:$0xff] }
  0x89   :  { %3351 = vmatpush1.bf16.msra.mxu0 %v3350_v54  ;;  %v398_v54 = vld [vmem:[#allocation7 + $0x8] sm:$0xff] }
  0x8a   :  { %v3384_v56 = vpack.c.bf16 %v398_v54, %v397_v53  ;;  %v4278_v53 = vld [vmem:[#allocation2 + $0x188] sm:$0xff]  ;;  %v4284_v54 = vld [vmem:[#allocation2 + $0x198] sm:$0xff] }
  0x8b   :  { %2860 = vmatmul.mubr.f32.gmra.mrb[2].mxu1 %v4054_v5  ;;  %v4166_v5 = vld [vmem:[#allocation2 + $0x90] sm:$0xff] }
  0x8c   :  { %237 = vmatmul.mubr.f32.vlgmr.msra.gmra.mrb[0].mxu0 %v76_v59  ;;  %v400_v59 = vld [vmem:[#allocation7 + $0x18] sm:$0xff]  ;;  %3385 = vmatprep.subr.bf16.mxu1 %v3384_v56 }
  0x8d   :  { %241 = vmatprep.mubr.f32.mxu0 %v79_v62  ;;  %v3388_v62 = vpack.c.bf16 %v400_v59, %v399_v58  ;;  %3387 = vmatpush3.bf16.msra.mxu1 %v3384_v56  ;;  %v4290_v56 = vld [vmem:[#allocation2 + $0x1a8] sm:$0xff]  ;;  %v4296_v58 = vld [vmem:[#allocation2 + $0x1b8] sm:$0xff]  ;;  %v4300_v59 = vld [vmem:[#allocation2 + $0x1b0] sm:$0xff] }
  0x8e   :  { %2862 = vmatprep.mubr.f32.mxu1 %v4059_v7  ;;  %v3400_v7 = vpack.c.bf16 %v406_v25, %v405_v3  ;;  %v1197_v25 = vld [vmem:[#allocation8 + $0xa0] sm:$0xff] }
  0x8f   :  { %3389 = vmatprep.subr.bf16.mxu1 %v3388_v62  ;;  %2863 = vmatmul.mubr.f32.gmra.mrb[4].mxu1 %v4061_v8  ;;  %v4174_v8 = vld [vmem:[#allocation2 + $0xa0] sm:$0xff] }
  0x90   :  { %242 = vmatmul.mubr.f32.gmra.mrb[2].mxu0 %v78_v6  ;;  %v93_v6 = vld [vmem:[#allocation2 + $0x88] sm:$0xff]  ;;  %2865 = vmatprep.mubr.f32.mxu1 %v4066_v10  ;;  %v4176_v10 = vld [vmem:[#allocation2 + $0xb8] sm:$0xff] }
  0x91   :  { %246 = vmatprep.mubr.f32.mxu0 %v81_v13  ;;  %v403_v13 = vld [vmem:[#allocation7 + $0x30] sm:$0xff]  ;;  %3391 = vmatpush3.bf16.msra.mxu1 %v3388_v62  ;;  %v4308_v62 = vld [vmem:[#allocation2 + $0x1d8] sm:$0xff] }
  0x92   :  { %3393 = vmatprep.subr.bf16.mxu1 %v3392_v9 }
  0x93   :  { %2866 = vmatmul.mubr.f32.gmra.mrb[6].mxu1 %v4068_v11  ;;  %v4182_v11 = vld [vmem:[#allocation2 + $0xb0] sm:$0xff] }
  0x94   :  { %247 = vmatmul.mubr.f32.gmra.mrb[4].mxu0 %v80_v22  ;;  %v3396_v22 = vpack.c.bf16 %v404_v16, %v403_v13  ;;  %2868 = vmatprep.mubr.f32.mxu1 %v4076_v14  ;;  %v4184_v14 = vld [vmem:[#allocation2 + $0xc8] sm:$0xff]  ;;  %v1193_v13 = vld [vmem:[#allocation8 + $0x80] sm:$0xff] }
  0x95   :  { %251 = vmatprep.mubr.f32.mxu0 %v83_v28  ;;  %3395 = vmatpush3.bf16.msra.mxu1 %v3392_v9  ;;  %v4168_v28 = vld [vmem:[#allocation2 + $0xa8] sm:$0xff]  ;;  %v4324_v9 = vld [vmem:[#allocation2 + $0x1f0] sm:$0xff] }
  0x96   :  { %3397 = vmatprep.subr.bf16.mxu1 %v3396_v22  ;;  %v1194_v16 = vld [vmem:[#allocation8 + $0x88] sm:$0xff] }
  0x97   :  { %2869 = vmatmul.mubr.f32.gmra.mrb[8].mxu1 %v4078_v15  ;;  %v4190_v15 = vld [vmem:[#allocation2 + $0xc0] sm:$0xff] }
  0x98   :  { %252 = vmatmul.mubr.f32.gmra.mrb[6].mxu0 %v82_v37  ;;  %v3404_v37 = vpack.c.bf16 %v408_v34, %v407_v31  ;;  %2871 = vmatprep.mubr.f32.mxu1 %v4083_v17  ;;  %v4192_v17 = vld [vmem:[#allocation2 + $0xd8] sm:$0xff] }
  0x99   :  { %256 = vmatprep.mubr.f32.mxu0 %v85_v43  ;;  %3399 = vmatpush3.bf16.msra.mxu1 %v3396_v22  ;;  %v410_v43 = vld [vmem:[#allocation7 + $0x68] sm:$0xff]  ;;  %v1196_v22 = vld [vmem:[#allocation8 + $0x98] sm:$0xff] }
  0x9a   :  { %3401 = vmatprep.subr.bf16.mxu1 %v3400_v7  ;;  %v3408_v46 = vpack.c.bf16 %v410_v43, %v409_v40  ;;  %v1199_v40 = vld [vmem:[#allocation8 + $0xb0] sm:$0xff]  ;;  %v1200_v43 = vld [vmem:[#allocation8 + $0xb8] sm:$0xff] }
  0x9b   :  { %2872 = vmatmul.mubr.f32.gmra.mrb[10].mxu1 %v4085_v18  ;;  %v4198_v18 = vld [vmem:[#allocation2 + $0xd0] sm:$0xff] }
  0x9c   :  { %257 = vmatmul.mubr.f32.gmra.mrb[8].mxu0 %v84_v48  ;;  %2874 = vmatprep.mubr.f32.mxu1 %v4090_v20  ;;  %v4200_v20 = vld [vmem:[#allocation2 + $0xe8] sm:$0xff]  ;;  %v412_v48 = vld [vmem:[#allocation7 + $0x78] sm:$0xff] }
  0x9d   :  { %261 = vmatprep.mubr.f32.mxu0 %v87_v52  ;;  %3403 = vmatpush3.bf16.msra.mxu1 %v3400_v7  ;;  %v4276_v52 = vld [vmem:[#allocation2 + $0x170] sm:$0xff]  ;;  %v1198_v7 = vld [vmem:[#allocation8 + $0xa8] sm:$0xff] }
  0x9e   :  { %3405 = vmatprep.subr.bf16.mxu1 %v3404_v37 }
  0x9f   :  { %2875 = vmatmul.mubr.f32.gmra.mrb[12].mxu1 %v4092_v21  ;;  %v4206_v21 = vld [vmem:[#allocation2 + $0xe0] sm:$0xff] }
  0xa0   :  { %262 = vmatmul.mubr.f32.gmra.mrb[10].mxu0 %v86_v55  ;;  %2877 = vmatprep.mubr.f32.mxu1 %v4097_v23  ;;  %v4214_v23 = vld [vmem:[#allocation2 + $0xf0] sm:$0xff] }
  0xa1   :  { %266 = vmatprep.mubr.f32.mxu0 %v89_v57  ;;  %3407 = vmatpush3.bf16.msra.mxu1 %v3404_v37  ;;  %v4288_v55 = vld [vmem:[#allocation2 + $0x190] sm:$0xff]  ;;  %v4294_v57 = vld [vmem:[#allocation2 + $0x1a0] sm:$0xff]  ;;  %v3472_v37 = vpack.c.bf16 %v1198_v7, %v1197_v25 }
  0xa2   :  { %3409 = vmatprep.subr.bf16.mxu1 %v3408_v46 }
  0xa3   :  { %2878 = vmatmul.mubr.f32.gmra.mrb[14].mxu1 %v4099_v24  ;;  %v4216_v24 = vld [vmem:[#allocation2 + $0x108] sm:$0xff] }
  0xa4   :  { %267 = vmatmul.mubr.f32.gmra.mrb[12].mxu0 %v88_v60  ;;  %2880 = vmatprep.mubr.f32.mxu1 %v4104_v26  ;;  %v4222_v26 = vld [vmem:[#allocation2 + $0x100] sm:$0xff]  ;;  %v4302_v60 = vld [vmem:[#allocation2 + $0x1c8] sm:$0xff] }
  0xa5   :  { %271 = vmatprep.mubr.f32.mxu0 %v91_v61  ;;  %3411 = vmatpush3.bf16.msra.mxu1 %v3408_v46  ;;  %v4306_v61 = vld [vmem:[#allocation2 + $0x1c0] sm:$0xff] }
  0xa7   :  { %2881 = vmatmul.mubr.f32.gmra.mrb[16].mxu1 %v4106_v27  ;;  %v4224_v27 = vld [vmem:[#allocation2 + $0x118] sm:$0xff] }
  0xa8   :  { %272 = vmatmul.mubr.f32.gmra.mrb[14].mxu0 %v90_v4  ;;  %2883 = vmatprep.mubr.f32.mxu1 %v4111_v29  ;;  %v4230_v29 = vld [vmem:[#allocation2 + $0x110] sm:$0xff]  ;;  %v4318_v4 = vld [vmem:[#allocation2 + $0x1e0] sm:$0xff] }
  0xa9   :  { %276 = vmatprep.mubr.f32.mxu0 %v93_v6  ;;  %v4320_v6 = vld [vmem:[#allocation2 + $0x1f8] sm:$0xff] }
  0xab   :  { %2884 = vmatmul.mubr.f32.gmra.mrb[18].mxu1 %v4113_v30  ;;  %v4232_v30 = vld [vmem:[#allocation2 + $0x128] sm:$0xff] }
  0xac   :  { %277 = vmatmul.mubr.f32.gmra.mrb[16].mxu0 %v92_v2  ;;  %2886 = vmatprep.mubr.f32.mxu1 %v4118_v32  ;;  %v4238_v32 = vld [vmem:[#allocation2 + $0x120] sm:$0xff]  ;;  %v1195_v2 = vld [vmem:[#allocation8 + $0x90] sm:$0xff] }
  0xad   :  { %281 = vmatprep.mubr.f32.mxu0 %v95_v19  ;;  %v3464_v19 = vpack.c.bf16 %v1194_v16, %v1193_v13  ;;  %v3468_v3 = vpack.c.bf16 %v1196_v22, %v1195_v2  ;;  %v1202_v13 = vld [vmem:[#allocation8 + $0xc8] sm:$0xff] }
  0xaf   :  { %2887 = vmatmul.mubr.f32.gmra.mrb[20].mxu1 %v4120_v33  ;;  %v4240_v33 = vld [vmem:[#allocation2 + $0x138] sm:$0xff]  ;;  %3465 = vmatprep.subr.bf16.mxu0 %v3464_v19 }
  0xb0   :  { %282 = vmatmul.mubr.f32.gmra.mrb[18].mxu0 %v4166_v5  ;;  %2889 = vmatprep.mubr.f32.mxu1 %v4125_v35  ;;  %v4246_v35 = vld [vmem:[#allocation2 + $0x130] sm:$0xff] }
  0xb1   :  { %286 = vmatprep.mubr.f32.mxu0 %v4168_v28  ;;  %3467 = vmatpush3.bf16.msra.mxu0 %v3464_v19  ;;  %v1204_v19 = vld [vmem:[#allocation8 + $0xd8] sm:$0xff] }
  0xb2   :  { %3469 = vmatprep.subr.bf16.mxu0 %v3468_v3 }
  0xb3   :  { %2890 = vmatmul.mubr.f32.gmra.mrb[22].mxu1 %v4127_v36  ;;  %v4248_v36 = vld [vmem:[#allocation2 + $0x148] sm:$0xff] }
  0xb4   :  { %287 = vmatmul.mubr.f32.gmra.mrb[20].mxu0 %v4174_v8  ;;  %2892 = vmatprep.mubr.f32.mxu1 %v4132_v38  ;;  %v4254_v38 = vld [vmem:[#allocation2 + $0x140] sm:$0xff] }
  0xb5   :  { %291 = vmatprep.mubr.f32.mxu0 %v4176_v10  ;;  %3471 = vmatpush3.bf16.msra.mxu0 %v3468_v3  ;;  %v1206_v3 = vld [vmem:[#allocation8 + $0xe8] sm:$0xff] }
  0xb6   :  { %3473 = vmatprep.subr.bf16.mxu0 %v3472_v37 }
  0xb7   :  { %2893 = vmatmul.mubr.f32.gmra.mrb[24].mxu1 %v4134_v39  ;;  %v4256_v39 = vld [vmem:[#allocation2 + $0x158] sm:$0xff] }
  0xb8   :  { %292 = vmatmul.mubr.f32.gmra.mrb[22].mxu0 %v4182_v11  ;;  %2895 = vmatprep.mubr.f32.mxu1 %v4139_v41  ;;  %v4262_v41 = vld [vmem:[#allocation2 + $0x150] sm:$0xff] }
  0xb9   :  { %296 = vmatprep.mubr.f32.mxu0 %v4184_v14  ;;  %3475 = vmatpush3.bf16.msra.mxu0 %v3472_v37 }
  0xbb   :  { %2896 = vmatmul.mubr.f32.gmra.mrb[26].mxu1 %v4141_v42  ;;  %v411_v42 = vld [vmem:[#allocation7 + $0x70] sm:$0xff] }
  0xbc   :  { %297 = vmatmul.mubr.f32.gmra.mrb[24].mxu0 %v4190_v15  ;;  %2898 = vmatprep.mubr.f32.mxu1 %v4146_v44  ;;  %v3412_v44 = vpack.c.bf16 %v412_v48, %v411_v42  ;;  %v3476_v48 = vpack.c.bf16 %v1200_v43, %v1199_v40 }
  0xbd   :  { %301 = vmatprep.mubr.f32.mxu0 %v4192_v17 }
  0xbe   :  { %3413 = vmatprep.subr.bf16.mxu1 %v3412_v44  ;;  %3477 = vmatprep.subr.bf16.mxu0 %v3476_v48 }
  0xbf   :  { %2899 = vmatmul.mubr.f32.gmra.mrb[28].mxu1 %v4148_v45  ;;  %v4269_v45 = vld [vmem:[#allocation2 + $0x160] sm:$0xff]  ;;  %3479 = vmatpush3.bf16.msra.mxu0 %v3476_v48 }
  0xc0   :  { %302 = vmatmul.mubr.f32.gmra.mrb[26].mxu0 %v4198_v18  ;;  %2901 = vmatprep.mubr.f32.mxu1 %v4153_v50  ;;  %v4271_v50 = vld [vmem:[#allocation2 + $0x178] sm:$0xff] }
  0xc1   :  { %306 = vmatprep.mubr.f32.mxu0 %v4200_v20  ;;  %3415 = vmatpush3.bf16.msra.mxu1 %v3412_v44  ;;  %v1201_v44 = vld [vmem:[#allocation8 + $0xc0] sm:$0xff] }
  0xc2   :  { %3416 = vmatprep.subr.bf16.mxu1 %v4736_v0  ;;  %v3480_v22 = vpack.c.bf16 %v1202_v13, %v1201_v44 }
  0xc3   :  { %2902 = vmatmul.mubr.f32.gmra.mrb[30].mxu1 %v4155_v51  ;;  %v4282_v51 = vld [vmem:[#allocation2 + $0x180] sm:$0xff] }
  0xc4   :  { %307 = vmatmul.mubr.f32.gmra.mrb[28].mxu0 %v4206_v21  ;;  %3481 = vmatprep.subr.bf16.mxu0 %v3480_v22 }
  0xc5   :  { %311 = vmatprep.mubr.f32.mxu0 %v4208_v47  ;;  %3483 = vmatpush3.bf16.msra.mxu0 %v3480_v22 }
  0xc8   :  { %312 = vmatmul.mubr.f32.gmra.mrb[30].mxu0 %v4214_v23 }
  0xc9   :  { %316 = vmatprep.mubr.f32.mxu0 %v4216_v24 }
  0xcc   :  { %317 = vmatmul.mubr.f32.gmra.mrb[32].mxu0 %v4222_v26 }
  0xcd   :  { %321 = vmatprep.mubr.f32.mxu0 %v4224_v27 }
  0xd0   :  { %322 = vmatmul.mubr.f32.gmra.mrb[34].mxu0 %v4230_v29 }
  0xd1   :  { %326 = vmatprep.mubr.f32.mxu0 %v4232_v30 }
  0xd4   :  { %327 = vmatmul.mubr.f32.gmra.mrb[36].mxu0 %v4238_v32 }
  0xd5   :  { %331 = vmatprep.mubr.f32.mxu0 %v4240_v33 }
  0xd8   :  { %332 = vmatmul.mubr.f32.gmra.mrb[38].mxu0 %v4246_v35 }
  0xd9   :  { %336 = vmatprep.mubr.f32.mxu0 %v4248_v36 }
  0xdc   :  { %337 = vmatmul.mubr.f32.gmra.mrb[40].mxu0 %v4254_v38 }
  0xdd   :  { %341 = vmatprep.mubr.f32.mxu0 %v4256_v39 }
  0xe0   :  { %342 = vmatmul.mubr.f32.gmra.mrb[42].mxu0 %v4262_v41 }
  0xe1   :  { %346 = vmatprep.mubr.f32.mxu0 %v4264_v49 }
  0xe4   :  { %347 = vmatmul.mubr.f32.gmra.mrb[44].mxu0 %v4269_v45 }
  0xe5   :  { %351 = vmatprep.mubr.f32.mxu0 %v4271_v50 }
  0xe8   :  { %352 = vmatmul.mubr.f32.gmra.mrb[46].mxu0 %v4276_v52 }
  0xe9   :  { %356 = vmatprep.mubr.f32.mxu0 %v4278_v53 }
  0xec   :  { %357 = vmatmul.mubr.f32.gmra.mrb[48].mxu0 %v4282_v51 }
  0xed   :  { %361 = vmatprep.mubr.f32.mxu0 %v4284_v54 }
  0xf0   :  { %362 = vmatmul.mubr.f32.gmra.mrb[50].mxu0 %v4288_v55 }
  0xf1   :  { %366 = vmatprep.mubr.f32.mxu0 %v4290_v56 }
  0xf4   :  { %367 = vmatmul.mubr.f32.gmra.mrb[52].mxu0 %v4294_v57 }
  0xf5   :  { %371 = vmatprep.mubr.f32.mxu0 %v4296_v58 }
  0xf8   :  { %372 = vmatmul.mubr.f32.gmra.mrb[54].mxu0 %v4300_v59 }
  0xf9   :  { %376 = vmatprep.mubr.f32.mxu0 %v4302_v60 }
  0xfc   :  { %377 = vmatmul.mubr.f32.gmra.mrb[56].mxu0 %v4306_v61 }
  0xfd   :  { %381 = vmatprep.mubr.f32.mxu0 %v4308_v62 }
 0x100   :  { %382 = vmatmul.mubr.f32.gmra.mrb[58].mxu0 %v4312_v63 }
 0x101   :  { %386 = vmatprep.mubr.f32.mxu0 %v4314_v1 }
 0x104   :  { %387 = vmatmul.mubr.f32.gmra.mrb[60].mxu0 %v4318_v4 }
 0x105   :  { %391 = vmatprep.mubr.f32.mxu0 %v4320_v6 }
 0x108   :  { %392 = vmatmul.mubr.f32.gmra.mrb[62].mxu0 %v4324_v9 }
 0x15f   :  { %v238_v31 = vpop.f32.mrb[0].mxu0 }
 0x160   :  { %v240_v34 = vpop.f32.mrb[1].mxu0  ;;  %2936 = vmatprep.mubr.f32.mxu1 %v238_v31  ;;  %v1203_v31 = vld [vmem:[#allocation8 + $0xd0] sm:$0xff] }
 0x161   :  { %v3484_v7 = vpack.c.bf16 %v1204_v19, %v1203_v31 }
 0x163   :  { %v243_v46 = vpop.f32.mrb[2].mxu0  ;;  %3485 = vmatprep.subr.bf16.mxu0 %v3484_v7 }
 0x164   :  { %v245_v42 = vpop.f32.mrb[3].mxu0  ;;  %2937 = vmatmul.mubr.f32.vlgmr.msra.gmra.mrb[0].mxu1 %v243_v46  ;;  %v1205_v46 = vld [vmem:[#allocation8 + $0xe0] sm:$0xff]  ;;  %3487 = vmatpush3.bf16.msra.mxu0 %v3484_v7 }
 0x165   :  { %v3488_v43 = vpack.c.bf16 %v1206_v3, %v1205_v46 }
 0x167   :  { %v248_v16 = vpop.f32.mrb[4].mxu0  ;;  %3489 = vmatprep.subr.bf16.mxu0 %v3488_v43 }
 0x168   :  { %v250_v2 = vpop.f32.mrb[5].mxu0  ;;  %2939 = vmatprep.mubr.f32.mxu1 %v248_v16  ;;  %3491 = vmatpush3.bf16.msra.mxu0 %v3488_v43 }
 0x16b   :  { %v253_v34 = vpop.f32.mrb[6].mxu0 }
 0x16c   :  { %v255_v25 = vpop.f32.mrb[7].mxu0  ;;  %2940 = vmatmul.mubr.f32.gmra.mrb[2].mxu1 %v253_v34 }
 0x16f   :  { %v258_v42 = vpop.f32.mrb[8].mxu0 }
 0x170   :  { %v260_v40 = vpop.f32.mrb[9].mxu0  ;;  %2942 = vmatprep.mubr.f32.mxu1 %v258_v42 }
 0x173   :  { %v263_v16 = vpop.f32.mrb[10].mxu0 }
 0x174   :  { %v265_v37 = vpop.f32.mrb[11].mxu0  ;;  %2943 = vmatmul.mubr.f32.gmra.mrb[4].mxu1 %v263_v16 }
 0x177   :  { %v268_v44 = vpop.f32.mrb[12].mxu0 }
 0x178   :  { %v270_v13 = vpop.f32.mrb[13].mxu0  ;;  %2945 = vmatprep.mubr.f32.mxu1 %v268_v44 }
 0x17b   :  { %v273_v48 = vpop.f32.mrb[14].mxu0 }
 0x17c   :  { %v275_v2 = vpop.f32.mrb[15].mxu0  ;;  %2946 = vmatmul.mubr.f32.gmra.mrb[6].mxu1 %v273_v48 }
 0x17f   :  { %v278_v31 = vpop.f32.mrb[16].mxu0 }
 0x180   :  { %v280_v19 = vpop.f32.mrb[17].mxu0  ;;  %2948 = vmatprep.mubr.f32.mxu1 %v278_v31 }
 0x183   :  { %v283_v34 = vpop.f32.mrb[18].mxu0 }
 0x184   :  { %v285_v25 = vpop.f32.mrb[19].mxu0  ;;  %2949 = vmatmul.mubr.f32.gmra.mrb[8].mxu1 %v283_v34 }
 0x187   :  { %v288_v22 = vpop.f32.mrb[20].mxu0 }
 0x188   :  { %v290_v46 = vpop.f32.mrb[21].mxu0  ;;  %2951 = vmatprep.mubr.f32.mxu1 %v288_v22 }
 0x18b   :  { %v293_v3 = vpop.f32.mrb[22].mxu0 }
 0x18c   :  { %v295_v42 = vpop.f32.mrb[23].mxu0  ;;  %2952 = vmatmul.mubr.f32.gmra.mrb[10].mxu1 %v293_v3 }
 0x18f   :  { %v298_v7 = vpop.f32.mrb[24].mxu0 }
 0x190   :  { %v300_v40 = vpop.f32.mrb[25].mxu0  ;;  %2954 = vmatprep.mubr.f32.mxu1 %v298_v7 }
 0x193   :  { %v303_v16 = vpop.f32.mrb[26].mxu0 }
 0x194   :  { %v305_v43 = vpop.f32.mrb[27].mxu0  ;;  %2955 = vmatmul.mubr.f32.gmra.mrb[12].mxu1 %v303_v16 }
 0x197   :  { %v308_v37 = vpop.f32.mrb[28].mxu0 }
 0x198   :  { %v310_v44 = vpop.f32.mrb[29].mxu0  ;;  %2957 = vmatprep.mubr.f32.mxu1 %v308_v37  ;;  %v1207_v37 = vld [vmem:[#allocation8 + $0xf0] sm:$0xff] }
 0x199   :  { %v1208_v44 = vld [vmem:[#allocation8 + $0xf8] sm:$0xff] }
 0x19b   :  { %v313_v13 = vpop.f32.mrb[30].mxu0 }
 0x19c   :  { %v315_v48 = vpop.f32.mrb[31].mxu0  ;;  %2958 = vmatmul.mubr.f32.gmra.mrb[14].mxu1 %v313_v13 }
 0x19d   :  { %v3492_v48 = vpack.c.bf16 %v1208_v44, %v1207_v37 }
 0x19f   :  { %v318_v2 = vpop.f32.mrb[32].mxu0  ;;  %3493 = vmatprep.subr.bf16.mxu0 %v3492_v48 }
 0x1a0   :  { %v320_v31 = vpop.f32.mrb[33].mxu0  ;;  %2960 = vmatprep.mubr.f32.mxu1 %v318_v2  ;;  %3495 = vmatpush3.bf16.msra.mxu0 %v3492_v48 }
 0x1a3   :  { %v323_v19 = vpop.f32.mrb[34].mxu0 }
 0x1a4   :  { %v325_v34 = vpop.f32.mrb[35].mxu0  ;;  %2961 = vmatmul.mubr.f32.gmra.mrb[16].mxu1 %v323_v19 }
 0x1a7   :  { %v328_v25 = vpop.f32.mrb[36].mxu0 }
 0x1a8   :  { %v330_v22 = vpop.f32.mrb[37].mxu0  ;;  %2963 = vmatprep.mubr.f32.mxu1 %v328_v25 }
 0x1ab   :  { %v333_v46 = vpop.f32.mrb[38].mxu0 }
 0x1ac   :  { %v335_v3 = vpop.f32.mrb[39].mxu0  ;;  %2964 = vmatmul.mubr.f32.gmra.mrb[18].mxu1 %v333_v46 }
 0x1af   :  { %v338_v42 = vpop.f32.mrb[40].mxu0 }
 0x1b0   :  { %v340_v7 = vpop.f32.mrb[41].mxu0  ;;  %2966 = vmatprep.mubr.f32.mxu1 %v338_v42 }
 0x1b3   :  { %v343_v40 = vpop.f32.mrb[42].mxu0 }
 0x1b4   :  { %v345_v16 = vpop.f32.mrb[43].mxu0  ;;  %2967 = vmatmul.mubr.f32.gmra.mrb[20].mxu1 %v343_v40 }
 0x1b7   :  { %v348_v43 = vpop.f32.mrb[44].mxu0 }
 0x1b8   :  { %v350_v13 = vpop.f32.mrb[45].mxu0  ;;  %2969 = vmatprep.mubr.f32.mxu1 %v348_v43 }
 0x1bb   :  { %v353_v2 = vpop.f32.mrb[46].mxu0 }
 0x1bc   :  { %v355_v31 = vpop.f32.mrb[47].mxu0  ;;  %2970 = vmatmul.mubr.f32.gmra.mrb[22].mxu1 %v353_v2 }
 0x1bd   :  { %v4331_v31 = vld [vmem:[%s4734_s4] ss:$0 sm:$0xff] }
 0x1bf   :  { %v358_v19 = vpop.f32.mrb[48].mxu0 }
 0x1c0   :  { %v360_v34 = vpop.f32.mrb[49].mxu0  ;;  %2972 = vmatprep.mubr.f32.mxu1 %v358_v19 }
 0x1c3   :  { %v363_v25 = vpop.f32.mrb[50].mxu0 }
 0x1c4   :  { %v365_v22 = vpop.f32.mrb[51].mxu0  ;;  %2973 = vmatmul.mubr.f32.gmra.mrb[24].mxu1 %v363_v25 }
 0x1c7   :  { %v368_v46 = vpop.f32.mrb[52].mxu0 }
 0x1c8   :  { %v370_v3 = vpop.f32.mrb[53].mxu0  ;;  %2975 = vmatprep.mubr.f32.mxu1 %v368_v46 }
 0x1cb   :  { %v373_v42 = vpop.f32.mrb[54].mxu0 }
 0x1cc   :  { %v375_v7 = vpop.f32.mrb[55].mxu0  ;;  %2976 = vmatmul.mubr.f32.gmra.mrb[26].mxu1 %v373_v42 }
 0x1cf   :  { %v378_v40 = vpop.f32.mrb[56].mxu0 }
 0x1d0   :  { %v380_v16 = vpop.f32.mrb[57].mxu0  ;;  %2978 = vmatprep.mubr.f32.mxu1 %v378_v40 }
 0x1d3   :  { %v383_v43 = vpop.f32.mrb[58].mxu0 }
 0x1d4   :  { %v385_v37 = vpop.f32.mrb[59].mxu0  ;;  %2979 = vmatmul.mubr.f32.gmra.mrb[28].mxu1 %v383_v43 }
 0x1d7   :  { %v388_v44 = vpop.f32.mrb[60].mxu0 }
 0x1d8   :  { %v390_v13 = vpop.f32.mrb[61].mxu0  ;;  %2981 = vmatprep.mubr.f32.mxu1 %v388_v44 }
 0x1db   :  { %v393_v48 = vpop.f32.mrb[62].mxu0 }
 0x1dc   :  { %v395_v2 = vpop.f32.mrb[63].mxu0  ;;  %2982 = vmatmul.mubr.f32.gmra.mrb[30].mxu1 %v393_v48 }
 0x1dd   :  { %1014 = vmatprep.mubr.f32.mxu1 %v4070_v12 }
 0x237   :  { %v2938_v19 = vpop.f32.mrb[0].mxu1 }
 0x238   :  { %v887_v34 = vadd.f32 %v2938_v19, %v4331_v31  ;;  %v720_v25 = vpop.f32.mrb[1].mxu1 }
 0x239   :  { %v886_v22 = vadd.f32 %v4331_v31, %v720_v25 }
 0x23a   :  { %v919_v46 = vmax.f32 %v887_v34, 0.0 }
 0x23b   :  { %v918_v3 = vmax.f32 %v886_v22, 0.0 }
 0x23d   :  { %v3417_v42 = vpack.c.bf16 %v919_v46, %v918_v3  ;;  %3016 = vmatprep.mubr.f32.mxu0 %v918_v3 }
 0x23e   :  { %3017 = vmatmul.mubr.f32.vlgmr.msra.gmra.mrb[64].mxu0 %v919_v46 }
 0x23f   :  { %v2941_v7 = vpop.f32.mrb[2].mxu1  ;;  %3418 = vmatpush1.bf16.msra.mxu1 %v3417_v42 }
 0x240   :  { %v889_v12 = vadd.f32 %v2941_v7, %v4331_v31  ;;  %v730_v40 = vpop.f32.mrb[3].mxu1  ;;  %3419 = vmatprep.subr.bf16.mxu1 %v4736_v0 }
 0x241   :  { %v888_v16 = vadd.f32 %v4331_v31, %v730_v40 }
 0x242   :  { %v921_v43 = vmax.f32 %v889_v12, 0.0 }
 0x243   :  { %v920_v37 = vmax.f32 %v888_v16, 0.0 }
 0x245   :  { %v3420_v44 = vpack.c.bf16 %v921_v43, %v920_v37  ;;  %3019 = vmatprep.mubr.f32.mxu0 %v920_v37 }
 0x246   :  { %3020 = vmatmul.mubr.f32.gmra.mrb[66].mxu0 %v921_v43 }
 0x247   :  { %v2944_v13 = vpop.f32.mrb[4].mxu1  ;;  %3421 = vmatpush1.bf16.msra.mxu1 %v3420_v44 }
 0x248   :  { %v891_v48 = vadd.f32 %v2944_v13, %v4331_v31  ;;  %v740_v2 = vpop.f32.mrb[5].mxu1  ;;  %3422 = vmatprep.subr.bf16.mxu1 %v4736_v0 }
 0x249   :  { %v890_v19 = vadd.f32 %v4331_v31, %v740_v2 }
 0x24a   :  { %v923_v34 = vmax.f32 %v891_v48, 0.0 }
 0x24b   :  { %v922_v25 = vmax.f32 %v890_v19, 0.0 }
 0x24d   :  { %v3423_v22 = vpack.c.bf16 %v923_v34, %v922_v25  ;;  %3022 = vmatprep.mubr.f32.mxu0 %v922_v25 }
 0x24e   :  { %3023 = vmatmul.mubr.f32.gmra.mrb[68].mxu0 %v923_v34 }
 0x24f   :  { %v2947_v46 = vpop.f32.mrb[6].mxu1  ;;  %3424 = vmatpush1.bf16.msra.mxu1 %v3423_v22 }
 0x250   :  { %v893_v3 = vadd.f32 %v2947_v46, %v4331_v31  ;;  %v750_v42 = vpop.f32.mrb[7].mxu1  ;;  %3425 = vmatprep.subr.bf16.mxu1 %v4736_v0 }
 0x251   :  { %v892_v7 = vadd.f32 %v4331_v31, %v750_v42 }
 0x252   :  { %v925_v12 = vmax.f32 %v893_v3, 0.0 }
 0x253   :  { %v924_v40 = vmax.f32 %v892_v7, 0.0 }
 0x255   :  { %v3426_v16 = vpack.c.bf16 %v925_v12, %v924_v40  ;;  %3025 = vmatprep.mubr.f32.mxu0 %v924_v40 }
 0x256   :  { %3026 = vmatmul.mubr.f32.gmra.mrb[70].mxu0 %v925_v12 }
 0x257   :  { %v2950_v43 = vpop.f32.mrb[8].mxu1  ;;  %3427 = vmatpush1.bf16.msra.mxu1 %v3426_v16 }
 0x258   :  { %v895_v37 = vadd.f32 %v2950_v43, %v4331_v31  ;;  %v760_v44 = vpop.f32.mrb[9].mxu1  ;;  %3428 = vmatprep.subr.bf16.mxu1 %v4736_v0 }
 0x259   :  { %v894_v13 = vadd.f32 %v4331_v31, %v760_v44 }
 0x25a   :  { %v927_v48 = vmax.f32 %v895_v37, 0.0 }
 0x25b   :  { %v926_v2 = vmax.f32 %v894_v13, 0.0 }
 0x25d   :  { %v3429_v19 = vpack.c.bf16 %v927_v48, %v926_v2  ;;  %3028 = vmatprep.mubr.f32.mxu0 %v926_v2 }
 0x25e   :  { %3029 = vmatmul.mubr.f32.gmra.mrb[72].mxu0 %v927_v48 }
 0x25f   :  { %v2953_v34 = vpop.f32.mrb[10].mxu1  ;;  %3430 = vmatpush1.bf16.msra.mxu1 %v3429_v19 }
 0x260   :  { %v897_v25 = vadd.f32 %v2953_v34, %v4331_v31  ;;  %v770_v22 = vpop.f32.mrb[11].mxu1  ;;  %3431 = vmatprep.subr.bf16.mxu1 %v4736_v0 }
 0x261   :  { %v896_v46 = vadd.f32 %v4331_v31, %v770_v22 }
 0x262   :  { %v929_v3 = vmax.f32 %v897_v25, 0.0 }
 0x263   :  { %v928_v42 = vmax.f32 %v896_v46, 0.0 }
 0x265   :  { %v3432_v7 = vpack.c.bf16 %v929_v3, %v928_v42  ;;  %3031 = vmatprep.mubr.f32.mxu0 %v928_v42 }
 0x266   :  { %3032 = vmatmul.mubr.f32.gmra.mrb[74].mxu0 %v929_v3 }
 0x267   :  { %v2956_v12 = vpop.f32.mrb[12].mxu1  ;;  %3433 = vmatpush1.bf16.msra.mxu1 %v3432_v7 }
 0x268   :  { %v899_v40 = vadd.f32 %v2956_v12, %v4331_v31  ;;  %v780_v16 = vpop.f32.mrb[13].mxu1  ;;  %3434 = vmatprep.subr.bf16.mxu1 %v4736_v0 }
 0x269   :  { %v898_v43 = vadd.f32 %v4331_v31, %v780_v16 }
 0x26a   :  { %v931_v37 = vmax.f32 %v899_v40, 0.0 }
 0x26b   :  { %v930_v44 = vmax.f32 %v898_v43, 0.0 }
 0x26d   :  { %v3435_v13 = vpack.c.bf16 %v931_v37, %v930_v44  ;;  %3034 = vmatprep.mubr.f32.mxu0 %v930_v44 }
 0x26e   :  { %3035 = vmatmul.mubr.f32.gmra.mrb[76].mxu0 %v931_v37 }
 0x26f   :  { %v2959_v48 = vpop.f32.mrb[14].mxu1  ;;  %3436 = vmatpush1.bf16.msra.mxu1 %v3435_v13 }
 0x270   :  { %v901_v2 = vadd.f32 %v2959_v48, %v4331_v31  ;;  %v790_v19 = vpop.f32.mrb[15].mxu1  ;;  %3437 = vmatprep.subr.bf16.mxu1 %v4736_v0 }
 0x271   :  { %v900_v34 = vadd.f32 %v4331_v31, %v790_v19 }
 0x272   :  { %v933_v25 = vmax.f32 %v901_v2, 0.0 }
 0x273   :  { %v932_v22 = vmax.f32 %v900_v34, 0.0 }
 0x275   :  { %v3438_v46 = vpack.c.bf16 %v933_v25, %v932_v22  ;;  %3037 = vmatprep.mubr.f32.mxu0 %v932_v22 }
 0x276   :  { %3038 = vmatmul.mubr.f32.gmra.mrb[78].mxu0 %v933_v25 }
 0x277   :  { %v2962_v3 = vpop.f32.mrb[16].mxu1  ;;  %3439 = vmatpush1.bf16.msra.mxu1 %v3438_v46 }
 0x278   :  { %v903_v42 = vadd.f32 %v2962_v3, %v4331_v31  ;;  %v800_v7 = vpop.f32.mrb[17].mxu1  ;;  %3440 = vmatprep.subr.bf16.mxu1 %v4736_v0 }
 0x279   :  { %v902_v12 = vadd.f32 %v4331_v31, %v800_v7 }
 0x27a   :  { %v935_v40 = vmax.f32 %v903_v42, 0.0 }
 0x27b   :  { %v934_v16 = vmax.f32 %v902_v12, 0.0 }
 0x27d   :  { %v3441_v43 = vpack.c.bf16 %v935_v40, %v934_v16  ;;  %3040 = vmatprep.mubr.f32.mxu0 %v934_v16 }
 0x27e   :  { %3041 = vmatmul.mubr.f32.gmra.mrb[80].mxu0 %v935_v40 }
 0x27f   :  { %v2965_v37 = vpop.f32.mrb[18].mxu1  ;;  %3442 = vmatpush1.bf16.msra.mxu1 %v3441_v43 }
 0x280   :  { %v905_v44 = vadd.f32 %v2965_v37, %v4331_v31  ;;  %v810_v13 = vpop.f32.mrb[19].mxu1  ;;  %3443 = vmatprep.subr.bf16.mxu1 %v4736_v0 }
 0x281   :  { %v904_v48 = vadd.f32 %v4331_v31, %v810_v13 }
 0x282   :  { %v937_v2 = vmax.f32 %v905_v44, 0.0 }
 0x283   :  { %v936_v19 = vmax.f32 %v904_v48, 0.0 }
 0x285   :  { %v3444_v34 = vpack.c.bf16 %v937_v2, %v936_v19  ;;  %3043 = vmatprep.mubr.f32.mxu0 %v936_v19 }
 0x286   :  { %3044 = vmatmul.mubr.f32.gmra.mrb[82].mxu0 %v937_v2 }
 0x287   :  { %v2968_v25 = vpop.f32.mrb[20].mxu1  ;;  %3445 = vmatpush1.bf16.msra.mxu1 %v3444_v34 }
 0x288   :  { %v907_v22 = vadd.f32 %v2968_v25, %v4331_v31  ;;  %v820_v46 = vpop.f32.mrb[21].mxu1  ;;  %3446 = vmatprep.subr.bf16.mxu1 %v4736_v0 }
 0x289   :  { %v906_v3 = vadd.f32 %v4331_v31, %v820_v46 }
 0x28a   :  { %v939_v42 = vmax.f32 %v907_v22, 0.0 }
 0x28b   :  { %v938_v7 = vmax.f32 %v906_v3, 0.0 }
 0x28d   :  { %v3447_v12 = vpack.c.bf16 %v939_v42, %v938_v7  ;;  %3046 = vmatprep.mubr.f32.mxu0 %v938_v7 }
 0x28e   :  { %3047 = vmatmul.mubr.f32.gmra.mrb[84].mxu0 %v939_v42 }
 0x28f   :  { %v2971_v40 = vpop.f32.mrb[22].mxu1  ;;  %3448 = vmatpush1.bf16.msra.mxu1 %v3447_v12 }
 0x290   :  { %v909_v16 = vadd.f32 %v2971_v40, %v4331_v31  ;;  %v830_v43 = vpop.f32.mrb[23].mxu1  ;;  %3449 = vmatprep.subr.bf16.mxu1 %v4736_v0 }
 0x291   :  { %v908_v37 = vadd.f32 %v4331_v31, %v830_v43 }
 0x292   :  { %v941_v44 = vmax.f32 %v909_v16, 0.0 }
 0x293   :  { %v940_v13 = vmax.f32 %v908_v37, 0.0 }
 0x295   :  { %v3450_v48 = vpack.c.bf16 %v941_v44, %v940_v13  ;;  %3049 = vmatprep.mubr.f32.mxu0 %v940_v13 }
 0x296   :  { %3050 = vmatmul.mubr.f32.gmra.mrb[86].mxu0 %v941_v44 }
 0x297   :  { %v2974_v2 = vpop.f32.mrb[24].mxu1  ;;  %3451 = vmatpush1.bf16.msra.mxu1 %v3450_v48 }
 0x298   :  { %v911_v19 = vadd.f32 %v2974_v2, %v4331_v31  ;;  %v840_v34 = vpop.f32.mrb[25].mxu1  ;;  %3452 = vmatprep.subr.bf16.mxu1 %v4736_v0 }
 0x299   :  { %v910_v25 = vadd.f32 %v4331_v31, %v840_v34 }
 0x29a   :  { %v943_v22 = vmax.f32 %v911_v19, 0.0 }
 0x29b   :  { %v942_v46 = vmax.f32 %v910_v25, 0.0 }
 0x29d   :  { %v3453_v3 = vpack.c.bf16 %v943_v22, %v942_v46  ;;  %3052 = vmatprep.mubr.f32.mxu0 %v942_v46 }
 0x29e   :  { %3053 = vmatmul.mubr.f32.gmra.mrb[88].mxu0 %v943_v22 }
 0x29f   :  { %v2977_v42 = vpop.f32.mrb[26].mxu1  ;;  %3454 = vmatpush1.bf16.msra.mxu1 %v3453_v3 }
 0x2a0   :  { %v913_v7 = vadd.f32 %v2977_v42, %v4331_v31  ;;  %v850_v12 = vpop.f32.mrb[27].mxu1  ;;  %3455 = vmatprep.subr.bf16.mxu1 %v4736_v0 }
 0x2a1   :  { %v912_v40 = vadd.f32 %v4331_v31, %v850_v12 }
 0x2a2   :  { %v945_v16 = vmax.f32 %v913_v7, 0.0 }
 0x2a3   :  { %v944_v43 = vmax.f32 %v912_v40, 0.0 }
 0x2a5   :  { %v3456_v37 = vpack.c.bf16 %v945_v16, %v944_v43  ;;  %3055 = vmatprep.mubr.f32.mxu0 %v944_v43  ;;  %v1177_v43 = vld [vmem:[#allocation7 + $0x88] sm:$0xff] }
 0x2a6   :  { %3056 = vmatmul.mubr.f32.gmra.mrb[90].mxu0 %v945_v16  ;;  %v1176_v16 = vld [vmem:[#allocation7 + $0x80] sm:$0xff] }
 0x2a7   :  { %v2980_v44 = vpop.f32.mrb[28].mxu1  ;;  %3457 = vmatpush1.bf16.msra.mxu1 %v3456_v37  ;;  %v1178_v37 = vld [vmem:[#allocation7 + $0x90] sm:$0xff] }
 0x2a8   :  { %v915_v13 = vadd.f32 %v2980_v44, %v4331_v31  ;;  %v860_v48 = vpop.f32.mrb[29].mxu1  ;;  %3458 = vmatprep.subr.bf16.mxu1 %v4736_v0  ;;  %v3496_v44 = vpack.c.bf16 %v1177_v43, %v1176_v16  ;;  %v4393_v16 = vld [vmem:[#allocation2 + $0x20] sm:$0xff]  ;;  %v4396_v43 = vld [vmem:[#allocation2 + $0x38] sm:$0xff] }
 0x2a9   :  { %v914_v2 = vadd.f32 %v4331_v31, %v860_v48 }
 0x2aa   :  { %v947_v19 = vmax.f32 %v915_v13, 0.0  ;;  %v1179_v13 = vld [vmem:[#allocation7 + $0x98] sm:$0xff]  ;;  %3497 = vmatprep.subr.bf16.mxu0 %v3496_v44 }
 0x2ab   :  { %v946_v34 = vmax.f32 %v914_v2, 0.0  ;;  %v3500_v48 = vpack.c.bf16 %v1179_v13, %v1178_v37  ;;  %v1180_v2 = vld [vmem:[#allocation7 + $0xa0] sm:$0xff]  ;;  %3499 = vmatpush3.bf16.msra.mxu0 %v3496_v44  ;;  %v1186_v44 = vld [vmem:[#allocation7 + $0xd0] sm:$0xff]  ;;  %v1187_v13 = vld [vmem:[#allocation7 + $0xd8] sm:$0xff] }
 0x2ad   :  { %v3459_v25 = vpack.c.bf16 %v947_v19, %v946_v34  ;;  %3058 = vmatprep.mubr.f32.mxu0 %v946_v34  ;;  %v4381_v34 = vld [vmem:[#allocation2] sm:$0xff]  ;;  %3501 = vmatprep.subr.bf16.mxu0 %v3500_v48 }
 0x2ae   :  { %3059 = vmatmul.mubr.f32.gmra.mrb[92].mxu0 %v947_v19  ;;  %v1181_v19 = vld [vmem:[#allocation7 + $0xa8] sm:$0xff] }
 0x2af   :  { %v2983_v22 = vpop.f32.mrb[30].mxu1  ;;  %3460 = vmatpush1.bf16.msra.mxu1 %v3459_v25  ;;  %v3504_v25 = vpack.c.bf16 %v1181_v19, %v1180_v2  ;;  %3503 = vmatpush3.bf16.msra.mxu0 %v3500_v48  ;;  %v4399_v48 = vld [vmem:[#allocation2 + $0x30] sm:$0xff]  ;;  %v4402_v2 = vld [vmem:[#allocation2 + $0x48] sm:$0xff]  ;;  %v3516_v19 = vpack.c.bf16 %v1187_v13, %v1186_v44  ;;  %v4417_v44 = vld [vmem:[#allocation2 + $0x60] sm:$0xff] }
 0x2b0   :  { %v917_v46 = vadd.f32 %v2983_v22, %v4331_v31  ;;  %v870_v3 = vpop.f32.mrb[31].mxu1  ;;  %3461 = vmatprep.subr.bf16.mxu1 %v4736_v0  ;;  %v1182_v22 = vld [vmem:[#allocation7 + $0xb0] sm:$0xff] }
 0x2b1   :  { %v916_v42 = vadd.f32 %v4331_v31, %v870_v3  ;;  %v4384_v31 = vld [vmem:[#allocation2 + $0x18] sm:$0xff]  ;;  %v4387_v3 = vld [vmem:[#allocation2 + $0x10] sm:$0xff]  ;;  %3505 = vmatprep.subr.bf16.mxu0 %v3504_v25 }
 0x2b2   :  { %v949_v7 = vmax.f32 %v917_v46, 0.0  ;;  %v1183_v46 = vld [vmem:[#allocation7 + $0xb8] sm:$0xff]  ;;  %v4423_v13 = vld [vmem:[#allocation2 + $0x70] sm:$0xff] }
 0x2b3   :  { %v948_v12 = vmax.f32 %v916_v42, 0.0  ;;  %v4390_v42 = vld [vmem:[#allocation2 + $0x28] sm:$0xff]  ;;  %3507 = vmatpush3.bf16.msra.mxu0 %v3504_v25  ;;  %v1188_v25 = vld [vmem:[#allocation7 + $0xe0] sm:$0xff] }
 0x2b5   :  { %v3462_v40 = vpack.c.bf16 %v949_v7, %v948_v12  ;;  %3061 = vmatprep.mubr.f32.mxu0 %v948_v12  ;;  %v1184_v12 = vld [vmem:[#allocation7 + $0xc0] sm:$0xff] }
 0x2b6   :  { %3062 = vmatmul.mubr.f32.gmra.mrb[94].mxu0 %v949_v7  ;;  %v3508_v7 = vpack.c.bf16 %v1183_v46, %v1182_v22  ;;  %v1189_v22 = vld [vmem:[#allocation7 + $0xe8] sm:$0xff]  ;;  %v4405_v46 = vld [vmem:[#allocation2 + $0x40] sm:$0xff] }
 0x2b7   :  { %3463 = vmatpush1.bf16.msra.mxu1 %v3462_v40  ;;  %v1185_v40 = vld [vmem:[#allocation7 + $0xc8] sm:$0xff] }
 0x2b8   :  { %3528 = vmatprep.subr.bf16.mxu1 %v4736_v0  ;;  %3509 = vmatprep.subr.bf16.mxu0 %v3508_v7  ;;  %v3512_v37 = vpack.c.bf16 %v1185_v40, %v1184_v12  ;;  %v4408_v12 = vld [vmem:[#allocation2 + $0x58] sm:$0xff]  ;;  %v3520_v40 = vpack.c.bf16 %v1189_v22, %v1188_v25  ;;  %v4414_v0 = vld [vmem:[#allocation2 + $0x68] sm:$0xff] }
 0x2b9   :  { %3511 = vmatpush3.bf16.msra.mxu0 %v3508_v7  ;;  %v4411_v7 = vld [vmem:[#allocation2 + $0x50] sm:$0xff]  ;;  %v4426_v25 = vld [vmem:[#allocation2 + $0x88] sm:$0xff]  ;;  %v4432_v22 = vld [vmem:[#allocation2 + $0x98] sm:$0xff] }
 0x2ba   :  { %1015 = vmatmul.mubr.f32.vlgmr.msra.gmra.mrb[32].mxu1 %v4381_v34  ;;  %3513 = vmatprep.subr.bf16.mxu0 %v3512_v37 }
 0x2bb   :  { %1019 = vmatprep.mubr.f32.mxu1 %v4384_v31 }
 0x2bd   :  { %3515 = vmatpush3.bf16.msra.mxu0 %v3512_v37  ;;  %v4420_v37 = vld [vmem:[#allocation2 + $0x78] sm:$0xff] }
 0x2be   :  { %1020 = vmatmul.mubr.f32.gmra.mrb[34].mxu1 %v4387_v3  ;;  %3517 = vmatprep.subr.bf16.mxu0 %v3516_v19 }
 0x2bf   :  { %1024 = vmatprep.mubr.f32.mxu1 %v4390_v42 }
 0x2c1   :  { %3519 = vmatpush3.bf16.msra.mxu0 %v3516_v19  ;;  %v4429_v19 = vld [vmem:[#allocation2 + $0x80] sm:$0xff] }
 0x2c2   :  { %1025 = vmatmul.mubr.f32.gmra.mrb[36].mxu1 %v4393_v16  ;;  %3521 = vmatprep.subr.bf16.mxu0 %v3520_v40 }
 0x2c3   :  { %1029 = vmatprep.mubr.f32.mxu1 %v4396_v43 }
 0x2c5   :  { %3523 = vmatpush3.bf16.msra.mxu0 %v3520_v40 }
 0x2c6   :  { %1030 = vmatmul.mubr.f32.gmra.mrb[38].mxu1 %v4399_v48 }
 0x2c7   :  { %1034 = vmatprep.mubr.f32.mxu1 %v4402_v2 }
 0x2ca   :  { %1035 = vmatmul.mubr.f32.gmra.mrb[40].mxu1 %v4405_v46 }
 0x2cb   :  { %1039 = vmatprep.mubr.f32.mxu1 %v4408_v12 }
 0x2ce   :  { %1040 = vmatmul.mubr.f32.gmra.mrb[42].mxu1 %v4411_v7 }
 0x2cf   :  { %1044 = vmatprep.mubr.f32.mxu1 %v4414_v0 }
 0x2d2   :  { %1045 = vmatmul.mubr.f32.gmra.mrb[44].mxu1 %v4417_v44 }
 0x2d3   :  { %1049 = vmatprep.mubr.f32.mxu1 %v4420_v37 }
 0x2d6   :  { %1050 = vmatmul.mubr.f32.gmra.mrb[46].mxu1 %v4423_v13 }
 0x2d7   :  { %1054 = vmatprep.mubr.f32.mxu1 %v4426_v25 }
 0x2da   :  { %1055 = vmatmul.mubr.f32.gmra.mrb[48].mxu1 %v4429_v19 }
 0x2db   :  { %1059 = vmatprep.mubr.f32.mxu1 %v4432_v22 }
 0x2de   :  { %1060 = vmatmul.mubr.f32.gmra.mrb[50].mxu1 %v4166_v5  ;;  %v1190_v5 = vld [vmem:[#allocation7 + $0xf0] sm:$0xff] }
 0x2df   :  { %1064 = vmatprep.mubr.f32.mxu1 %v4168_v28  ;;  %v1191_v28 = vld [vmem:[#allocation7 + $0xf8] sm:$0xff] }
 0x2e2   :  { %1065 = vmatmul.mubr.f32.gmra.mrb[52].mxu1 %v4174_v8  ;;  %v3524_v8 = vpack.c.bf16 %v1191_v28, %v1190_v5 }
 0x2e3   :  { %1069 = vmatprep.mubr.f32.mxu1 %v4176_v10  ;;  %v3780_v10 = vld [vmem:[#allocation2 + $0x8] sm:$0xff] }
 0x2e4   :  { %3525 = vmatprep.subr.bf16.mxu0 %v3524_v8 }
 0x2e5   :  { %3527 = vmatpush3.bf16.msra.mxu0 %v3524_v8 }
 0x2e6   :  { %1070 = vmatmul.mubr.f32.gmra.mrb[54].mxu1 %v4182_v11  ;;  %v1974_v11 = vld [vmem:[#allocation8 + $0x100] sm:$0xff] }
 0x2e7   :  { %1074 = vmatprep.mubr.f32.mxu1 %v4184_v14  ;;  %v1975_v14 = vld [vmem:[#allocation8 + $0x108] sm:$0xff] }
 0x2ea   :  { %1075 = vmatmul.mubr.f32.gmra.mrb[56].mxu1 %v4190_v15  ;;  %v4480_v15 = vpack.c.bf16 %v1975_v14, %v1974_v11 }
 0x2eb   :  { %1079 = vmatprep.mubr.f32.mxu1 %v4192_v17 }
 0x2ec   :  { %3577 = vmatprep.subr.bf16.mxu0 %v4480_v15 }
 0x2ee   :  { %1080 = vmatmul.mubr.f32.gmra.mrb[58].mxu1 %v4198_v18  ;;  %v1976_v18 = vld [vmem:[#allocation8 + $0x110] sm:$0xff] }
 0x2ef   :  { %1084 = vmatprep.mubr.f32.mxu1 %v4200_v20  ;;  %v1977_v20 = vld [vmem:[#allocation8 + $0x118] sm:$0xff] }
 0x2f2   :  { %1085 = vmatmul.mubr.f32.gmra.mrb[60].mxu1 %v4206_v21 }
 0x2f3   :  { %1089 = vmatprep.mubr.f32.mxu1 %v4208_v47  ;;  %v4483_v47 = vpack.c.bf16 %v1977_v20, %v1976_v18 }
 0x2f6   :  { %1090 = vmatmul.mubr.f32.gmra.mrb[62].mxu1 %v4214_v23 }
 0x2f7   :  { %1094 = vmatprep.mubr.f32.mxu1 %v4216_v24  ;;  %v1978_v24 = vld [vmem:[#allocation8 + $0x120] sm:$0xff] }
 0x2fa   :  { %1095 = vmatmul.mubr.f32.gmra.mrb[64].mxu1 %v4222_v26  ;;  %v1979_v26 = vld [vmem:[#allocation8 + $0x128] sm:$0xff] }
 0x2fb   :  { %1099 = vmatprep.mubr.f32.mxu1 %v4224_v27 }
 0x2fe   :  { %1100 = vmatmul.mubr.f32.gmra.mrb[66].mxu1 %v4230_v29  ;;  %v4487_v29 = vpack.c.bf16 %v1979_v26, %v1978_v24 }
 0x2ff   :  { %1104 = vmatprep.mubr.f32.mxu1 %v4232_v30 }
 0x302   :  { %1105 = vmatmul.mubr.f32.gmra.mrb[68].mxu1 %v4238_v32  ;;  %v1980_v32 = vld [vmem:[#allocation8 + $0x130] sm:$0xff] }
 0x303   :  { %1109 = vmatprep.mubr.f32.mxu1 %v4240_v33  ;;  %v1981_v33 = vld [vmem:[#allocation8 + $0x138] sm:$0xff] }
 0x306   :  { %1110 = vmatmul.mubr.f32.gmra.mrb[70].mxu1 %v4246_v35 }
 0x307   :  { %1114 = vmatprep.mubr.f32.mxu1 %v4248_v36  ;;  %v4491_v36 = vpack.c.bf16 %v1981_v33, %v1980_v32 }
 0x30a   :  { %1115 = vmatmul.mubr.f32.gmra.mrb[72].mxu1 %v4254_v38 }
 0x30b   :  { %1119 = vmatprep.mubr.f32.mxu1 %v4256_v39  ;;  %v1982_v39 = vld [vmem:[#allocation8 + $0x140] sm:$0xff] }
 0x30e   :  { %1120 = vmatmul.mubr.f32.gmra.mrb[74].mxu1 %v4262_v41  ;;  %v1983_v41 = vld [vmem:[#allocation8 + $0x148] sm:$0xff] }
 0x30f   :  { %1124 = vmatprep.mubr.f32.mxu1 %v4264_v49 }
 0x312   :  { %1125 = vmatmul.mubr.f32.gmra.mrb[76].mxu1 %v4269_v45  ;;  %v4495_v45 = vpack.c.bf16 %v1983_v41, %v1982_v39 }
 0x313   :  { %1129 = vmatprep.mubr.f32.mxu1 %v4271_v50 }
 0x316   :  { %1130 = vmatmul.mubr.f32.gmra.mrb[78].mxu1 %v4276_v52  ;;  %v1984_v52 = vld [vmem:[#allocation8 + $0x150] sm:$0xff] }
 0x317   :  { %1134 = vmatprep.mubr.f32.mxu1 %v4278_v53  ;;  %v1985_v53 = vld [vmem:[#allocation8 + $0x158] sm:$0xff] }
 0x31a   :  { %1135 = vmatmul.mubr.f32.gmra.mrb[80].mxu1 %v4282_v51 }
 0x31b   :  { %1139 = vmatprep.mubr.f32.mxu1 %v4284_v54  ;;  %v4499_v54 = vpack.c.bf16 %v1985_v53, %v1984_v52  ;;  %v1988_v53 = vld [vmem:[#allocation8 + $0x170] sm:$0xff] }
 0x31e   :  { %1140 = vmatmul.mubr.f32.gmra.mrb[82].mxu1 %v4288_v55 }
 0x31f   :  { %1144 = vmatprep.mubr.f32.mxu1 %v4290_v56  ;;  %v1986_v56 = vld [vmem:[#allocation8 + $0x160] sm:$0xff] }
 0x322   :  { %1145 = vmatmul.mubr.f32.gmra.mrb[84].mxu1 %v4294_v57  ;;  %v1987_v57 = vld [vmem:[#allocation8 + $0x168] sm:$0xff] }
 0x323   :  { %1149 = vmatprep.mubr.f32.mxu1 %v4296_v58 }
 0x326   :  { %1150 = vmatmul.mubr.f32.gmra.mrb[86].mxu1 %v4300_v59  ;;  %v4503_v59 = vpack.c.bf16 %v1987_v57, %v1986_v56 }
 0x327   :  { %1154 = vmatprep.mubr.f32.mxu1 %v4302_v60 }
 0x32a   :  { %1155 = vmatmul.mubr.f32.gmra.mrb[88].mxu1 %v4306_v61 }
 0x32b   :  { %1159 = vmatprep.mubr.f32.mxu1 %v4308_v62 }
 0x32e   :  { %1160 = vmatmul.mubr.f32.gmra.mrb[90].mxu1 %v4312_v63 }
 0x32f   :  { %1164 = vmatprep.mubr.f32.mxu1 %v4314_v1 }
 0x332   :  { %1165 = vmatmul.mubr.f32.gmra.mrb[92].mxu1 %v4318_v4 }
 0x333   :  { %1169 = vmatprep.mubr.f32.mxu1 %v4320_v6 }
 0x336   :  { %1170 = vmatmul.mubr.f32.gmra.mrb[94].mxu1 %v4324_v9 }
 0x337   :  { %1795 = vmatprep.mubr.f32.mxu1 %v3780_v10 }
 0x38d   :  { %v1016_v17 = vpop.f32.mrb[32].mxu1 }
 0x38e   :  { %v1018_v21 = vpop.f32.mrb[33].mxu1  ;;  %3096 = vmatprep.mubr.f32.mxu0 %v1016_v17 }
 0x391   :  { %v1021_v23 = vpop.f32.mrb[34].mxu1 }
 0x392   :  { %v1023_v27 = vpop.f32.mrb[35].mxu1  ;;  %3097 = vmatmul.mubr.f32.vlgmr.msra.gmra.mrb[64].mxu0 %v1021_v23 }
 0x393   :  { %3579 = vmatpush3.bf16.msra.mxu0 %v4480_v15 }
 0x394   :  { %3581 = vmatprep.subr.bf16.mxu0 %v4483_v47 }
 0x395   :  { %v1026_v30 = vpop.f32.mrb[36].mxu1 }
 0x396   :  { %v1028_v35 = vpop.f32.mrb[37].mxu1  ;;  %3099 = vmatprep.mubr.f32.mxu0 %v1026_v30 }
 0x397   :  { %3583 = vmatpush3.bf16.msra.mxu0 %v4483_v47 }
 0x398   :  { %3585 = vmatprep.subr.bf16.mxu0 %v4487_v29 }
 0x399   :  { %v1031_v38 = vpop.f32.mrb[38].mxu1 }
 0x39a   :  { %v1033_v49 = vpop.f32.mrb[39].mxu1  ;;  %3100 = vmatmul.mubr.f32.gmra.mrb[66].mxu0 %v1031_v38 }
 0x39b   :  { %3587 = vmatpush3.bf16.msra.mxu0 %v4487_v29 }
 0x39c   :  { %3589 = vmatprep.subr.bf16.mxu0 %v4491_v36 }
 0x39d   :  { %v1036_v50 = vpop.f32.mrb[40].mxu1 }
 0x39e   :  { %v1038_v51 = vpop.f32.mrb[41].mxu1  ;;  %3102 = vmatprep.mubr.f32.mxu0 %v1036_v50 }
 0x39f   :  { %3591 = vmatpush3.bf16.msra.mxu0 %v4491_v36  ;;  %v1989_v51 = vld [vmem:[#allocation8 + $0x178] sm:$0xff] }
 0x3a0   :  { %3593 = vmatprep.subr.bf16.mxu0 %v4495_v45  ;;  %v4508_v56 = vpack.c.bf16 %v1989_v51, %v1988_v53 }
 0x3a1   :  { %v1041_v55 = vpop.f32.mrb[42].mxu1 }
 0x3a2   :  { %v1043_v58 = vpop.f32.mrb[43].mxu1  ;;  %3103 = vmatmul.mubr.f32.gmra.mrb[68].mxu0 %v1041_v55 }
 0x3a3   :  { %3595 = vmatpush3.bf16.msra.mxu0 %v4495_v45 }
 0x3a4   :  { %3597 = vmatprep.subr.bf16.mxu0 %v4499_v54 }
 0x3a5   :  { %v1046_v60 = vpop.f32.mrb[44].mxu1 }
 0x3a6   :  { %v1048_v61 = vpop.f32.mrb[45].mxu1  ;;  %3105 = vmatprep.mubr.f32.mxu0 %v1046_v60 }
 0x3a7   :  { %3599 = vmatpush3.bf16.msra.mxu0 %v4499_v54 }
 0x3a8   :  { %3601 = vmatprep.subr.bf16.mxu0 %v4503_v59 }
 0x3a9   :  { %v1051_v62 = vpop.f32.mrb[46].mxu1 }
 0x3aa   :  { %v1053_v63 = vpop.f32.mrb[47].mxu1  ;;  %3106 = vmatmul.mubr.f32.gmra.mrb[70].mxu0 %v1051_v62 }
 0x3ab   :  { %3603 = vmatpush3.bf16.msra.mxu0 %v4503_v59 }
 0x3ac   :  { %3605 = vmatprep.subr.bf16.mxu0 %v4508_v56 }
 0x3ad   :  { %v1056_v1 = vpop.f32.mrb[48].mxu1 }
 0x3ae   :  { %v1058_v4 = vpop.f32.mrb[49].mxu1  ;;  %3108 = vmatprep.mubr.f32.mxu0 %v1056_v1 }
 0x3af   :  { %3607 = vmatpush3.bf16.msra.mxu0 %v4508_v56 }
 0x3b1   :  { %v1061_v6 = vpop.f32.mrb[50].mxu1 }
 0x3b2   :  { %v1063_v9 = vpop.f32.mrb[51].mxu1  ;;  %3109 = vmatmul.mubr.f32.gmra.mrb[72].mxu0 %v1061_v6 }
 0x3b5   :  { %v1066_v40 = vpop.f32.mrb[52].mxu1 }
 0x3b6   :  { %v1068_v5 = vpop.f32.mrb[53].mxu1  ;;  %3111 = vmatprep.mubr.f32.mxu0 %v1066_v40 }
 0x3b9   :  { %v1071_v28 = vpop.f32.mrb[54].mxu1 }
 0x3ba   :  { %v1073_v8 = vpop.f32.mrb[55].mxu1  ;;  %3112 = vmatmul.mubr.f32.gmra.mrb[74].mxu0 %v1071_v28 }
 0x3bd   :  { %v1076_v10 = vpop.f32.mrb[56].mxu1 }
 0x3be   :  { %v1078_v11 = vpop.f32.mrb[57].mxu1  ;;  %3114 = vmatprep.mubr.f32.mxu0 %v1076_v10 }
 0x3c1   :  { %v1081_v14 = vpop.f32.mrb[58].mxu1 }
 0x3c2   :  { %v1083_v17 = vpop.f32.mrb[59].mxu1  ;;  %3115 = vmatmul.mubr.f32.gmra.mrb[76].mxu0 %v1081_v14 }
 0x3c5   :  { %v1086_v18 = vpop.f32.mrb[60].mxu1 }
 0x3c6   :  { %v1088_v20 = vpop.f32.mrb[61].mxu1  ;;  %3117 = vmatprep.mubr.f32.mxu0 %v1086_v18  ;;  %v4515_v18 = vld [vmem:[%s4734_s4 + $0x1] ss:$0 sm:$0xff] }
 0x3c9   :  { %v1091_v21 = vpop.f32.mrb[62].mxu1 }
 0x3ca   :  { %v1093_v23 = vpop.f32.mrb[63].mxu1  ;;  %3118 = vmatmul.mubr.f32.gmra.mrb[78].mxu0 %v1091_v21 }
 0x3cd   :  { %v1096_v24 = vpop.f32.mrb[64].mxu1 }
 0x3ce   :  { %v1098_v26 = vpop.f32.mrb[65].mxu1  ;;  %3120 = vmatprep.mubr.f32.mxu0 %v1096_v24 }
 0x3d1   :  { %v1101_v27 = vpop.f32.mrb[66].mxu1 }
 0x3d2   :  { %v1103_v30 = vpop.f32.mrb[67].mxu1  ;;  %3121 = vmatmul.mubr.f32.gmra.mrb[80].mxu0 %v1101_v27 }
 0x3d5   :  { %v1106_v32 = vpop.f32.mrb[68].mxu1 }
 0x3d6   :  { %v1108_v33 = vpop.f32.mrb[69].mxu1  ;;  %3123 = vmatprep.mubr.f32.mxu0 %v1106_v32 }
 0x3d9   :  { %v1111_v35 = vpop.f32.mrb[70].mxu1 }
 0x3da   :  { %v1113_v38 = vpop.f32.mrb[71].mxu1  ;;  %3124 = vmatmul.mubr.f32.gmra.mrb[82].mxu0 %v1111_v35 }
 0x3db   :  { %v4738_v38 = vmov 0.0|0.0  }
 0x3dd   :  { %v1116_v39 = vpop.f32.mrb[72].mxu1 }
 0x3de   :  { %v1118_v41 = vpop.f32.mrb[73].mxu1  ;;  %3126 = vmatprep.mubr.f32.mxu0 %v1116_v39 }
 0x3e1   :  { %v1121_v49 = vpop.f32.mrb[74].mxu1 }
 0x3e2   :  { %v1123_v50 = vpop.f32.mrb[75].mxu1  ;;  %3127 = vmatmul.mubr.f32.gmra.mrb[84].mxu0 %v1121_v49 }
 0x3e5   :  { %v1126_v52 = vpop.f32.mrb[76].mxu1 }
 0x3e6   :  { %v1128_v55 = vpop.f32.mrb[77].mxu1  ;;  %3129 = vmatprep.mubr.f32.mxu0 %v1126_v52 }
 0x3e9   :  { %v1131_v57 = vpop.f32.mrb[78].mxu1 }
 0x3ea   :  { %v1133_v58 = vpop.f32.mrb[79].mxu1  ;;  %3130 = vmatmul.mubr.f32.gmra.mrb[86].mxu0 %v1131_v57 }
 0x3ed   :  { %v1136_v60 = vpop.f32.mrb[80].mxu1 }
 0x3ee   :  { %v1138_v61 = vpop.f32.mrb[81].mxu1  ;;  %3132 = vmatprep.mubr.f32.mxu0 %v1136_v60 }
 0x3f1   :  { %v1141_v62 = vpop.f32.mrb[82].mxu1 }
 0x3f2   :  { %v1143_v63 = vpop.f32.mrb[83].mxu1  ;;  %3133 = vmatmul.mubr.f32.gmra.mrb[88].mxu0 %v1141_v62 }
 0x3f5   :  { %v1146_v1 = vpop.f32.mrb[84].mxu1 }
 0x3f6   :  { %v1148_v4 = vpop.f32.mrb[85].mxu1  ;;  %3135 = vmatprep.mubr.f32.mxu0 %v1146_v1 }
 0x3f9   :  { %v1151_v6 = vpop.f32.mrb[86].mxu1 }
 0x3fa   :  { %v1153_v9 = vpop.f32.mrb[87].mxu1  ;;  %3136 = vmatmul.mubr.f32.gmra.mrb[90].mxu0 %v1151_v6 }
 0x3fd   :  { %v1156_v40 = vpop.f32.mrb[88].mxu1 }
 0x3fe   :  { %v1158_v5 = vpop.f32.mrb[89].mxu1  ;;  %3138 = vmatprep.mubr.f32.mxu0 %v1156_v40 }
 0x401   :  { %v1161_v28 = vpop.f32.mrb[90].mxu1 }
 0x402   :  { %v1163_v8 = vpop.f32.mrb[91].mxu1  ;;  %3139 = vmatmul.mubr.f32.gmra.mrb[92].mxu0 %v1161_v28 }
 0x405   :  { %v1166_v10 = vpop.f32.mrb[92].mxu1 }
 0x406   :  { %v1168_v11 = vpop.f32.mrb[93].mxu1  ;;  %3141 = vmatprep.mubr.f32.mxu0 %v1166_v10 }
 0x409   :  { %v1171_v14 = vpop.f32.mrb[94].mxu1 }
 0x40a   :  { %v1173_v17 = vpop.f32.mrb[95].mxu1  ;;  %3142 = vmatmul.mubr.f32.gmra.mrb[94].mxu0 %v1171_v14 }
 0x465   :  { %v3098_v20 = vpop.f32.mrb[64].mxu0 }
 0x466   :  { %v1668_v21 = vadd.f32 %v3098_v20, %v4515_v18  ;;  %v1500_v23 = vpop.f32.mrb[65].mxu0 }
 0x467   :  { %v1667_v24 = vadd.f32 %v4515_v18, %v1500_v23 }
 0x468   :  { %v1700_v26 = vmax.f32 %v1668_v21, 0.0 }
 0x469   :  { %v1699_v27 = vmax.f32 %v1667_v24, 0.0 }
 0x46b   :  { %v3529_v30 = vpack.c.bf16 %v1700_v26, %v1699_v27  ;;  %3176 = vmatprep.mubr.f32.mxu0 %v1699_v27 }
 0x46c   :  { %3177 = vmatmul.mubr.f32.vlgmr.msra.gmra.mrb[96].mxu0 %v1700_v26 }
 0x46d   :  { %v3101_v32 = vpop.f32.mrb[66].mxu0  ;;  %3530 = vmatpush1.bf16.msra.mxu1 %v3529_v30 }
 0x46e   :  { %v1670_v33 = vadd.f32 %v3101_v32, %v4515_v18  ;;  %v1510_v35 = vpop.f32.mrb[67].mxu0  ;;  %3531 = vmatprep.subr.bf16.mxu1 %v4738_v38 }
 0x46f   :  { %v1669_v39 = vadd.f32 %v4515_v18, %v1510_v35 }
 0x470   :  { %v1702_v41 = vmax.f32 %v1670_v33, 0.0 }
 0x471   :  { %v1701_v49 = vmax.f32 %v1669_v39, 0.0 }
 0x473   :  { %v3532_v50 = vpack.c.bf16 %v1702_v41, %v1701_v49  ;;  %3179 = vmatprep.mubr.f32.mxu0 %v1701_v49 }
 0x474   :  { %3180 = vmatmul.mubr.f32.gmra.mrb[98].mxu0 %v1702_v41 }
 0x475   :  { %v3104_v52 = vpop.f32.mrb[68].mxu0  ;;  %3533 = vmatpush1.bf16.msra.mxu1 %v3532_v50 }
 0x476   :  { %v1672_v53 = vadd.f32 %v3104_v52, %v4515_v18  ;;  %v1520_v51 = vpop.f32.mrb[69].mxu0  ;;  %3534 = vmatprep.subr.bf16.mxu1 %v4738_v38 }
 0x477   :  { %v1671_v55 = vadd.f32 %v4515_v18, %v1520_v51 }
 0x478   :  { %v1704_v57 = vmax.f32 %v1672_v53, 0.0 }
 0x479   :  { %v1703_v58 = vmax.f32 %v1671_v55, 0.0 }
 0x47b   :  { %v3535_v60 = vpack.c.bf16 %v1704_v57, %v1703_v58  ;;  %3182 = vmatprep.mubr.f32.mxu0 %v1703_v58 }
 0x47c   :  { %3183 = vmatmul.mubr.f32.gmra.mrb[100].mxu0 %v1704_v57 }
 0x47d   :  { %v3107_v61 = vpop.f32.mrb[70].mxu0  ;;  %3536 = vmatpush1.bf16.msra.mxu1 %v3535_v60 }
 0x47e   :  { %v1674_v62 = vadd.f32 %v3107_v61, %v4515_v18  ;;  %v1530_v63 = vpop.f32.mrb[71].mxu0  ;;  %3537 = vmatprep.subr.bf16.mxu1 %v4738_v38 }
 0x47f   :  { %v1673_v1 = vadd.f32 %v4515_v18, %v1530_v63 }
 0x480   :  { %v1706_v4 = vmax.f32 %v1674_v62, 0.0 }
 0x481   :  { %v1705_v6 = vmax.f32 %v1673_v1, 0.0 }
 0x483   :  { %v3538_v9 = vpack.c.bf16 %v1706_v4, %v1705_v6  ;;  %3185 = vmatprep.mubr.f32.mxu0 %v1705_v6 }
 0x484   :  { %3186 = vmatmul.mubr.f32.gmra.mrb[102].mxu0 %v1706_v4 }
 0x485   :  { %v3110_v40 = vpop.f32.mrb[72].mxu0  ;;  %3539 = vmatpush1.bf16.msra.mxu1 %v3538_v9 }
 0x486   :  { %v1676_v5 = vadd.f32 %v3110_v40, %v4515_v18  ;;  %v1540_v28 = vpop.f32.mrb[73].mxu0  ;;  %3540 = vmatprep.subr.bf16.mxu1 %v4738_v38 }
 0x487   :  { %v1675_v8 = vadd.f32 %v4515_v18, %v1540_v28 }
 0x488   :  { %v1708_v10 = vmax.f32 %v1676_v5, 0.0 }
 0x489   :  { %v1707_v11 = vmax.f32 %v1675_v8, 0.0 }
 0x48b   :  { %v3541_v14 = vpack.c.bf16 %v1708_v10, %v1707_v11  ;;  %3188 = vmatprep.mubr.f32.mxu0 %v1707_v11 }
 0x48c   :  { %3189 = vmatmul.mubr.f32.gmra.mrb[104].mxu0 %v1708_v10 }
 0x48d   :  { %v3113_v17 = vpop.f32.mrb[74].mxu0  ;;  %3542 = vmatpush1.bf16.msra.mxu1 %v3541_v14 }
 0x48e   :  { %v1678_v20 = vadd.f32 %v3113_v17, %v4515_v18  ;;  %v1550_v21 = vpop.f32.mrb[75].mxu0  ;;  %3543 = vmatprep.subr.bf16.mxu1 %v4738_v38 }
 0x48f   :  { %v1677_v23 = vadd.f32 %v4515_v18, %v1550_v21 }
 0x490   :  { %v1710_v24 = vmax.f32 %v1678_v20, 0.0 }
 0x491   :  { %v1709_v26 = vmax.f32 %v1677_v23, 0.0 }
 0x493   :  { %v3544_v27 = vpack.c.bf16 %v1710_v24, %v1709_v26  ;;  %3191 = vmatprep.mubr.f32.mxu0 %v1709_v26 }
 0x494   :  { %3192 = vmatmul.mubr.f32.gmra.mrb[106].mxu0 %v1710_v24 }
 0x495   :  { %v3116_v30 = vpop.f32.mrb[76].mxu0  ;;  %3545 = vmatpush1.bf16.msra.mxu1 %v3544_v27 }
 0x496   :  { %v1680_v32 = vadd.f32 %v3116_v30, %v4515_v18  ;;  %v1560_v33 = vpop.f32.mrb[77].mxu0  ;;  %3546 = vmatprep.subr.bf16.mxu1 %v4738_v38 }
 0x497   :  { %v1679_v35 = vadd.f32 %v4515_v18, %v1560_v33 }
 0x498   :  { %v1712_v39 = vmax.f32 %v1680_v32, 0.0 }
 0x499   :  { %v1711_v41 = vmax.f32 %v1679_v35, 0.0 }
 0x49b   :  { %v3547_v49 = vpack.c.bf16 %v1712_v39, %v1711_v41  ;;  %3194 = vmatprep.mubr.f32.mxu0 %v1711_v41 }
 0x49c   :  { %3195 = vmatmul.mubr.f32.gmra.mrb[108].mxu0 %v1712_v39 }
 0x49d   :  { %v3119_v50 = vpop.f32.mrb[78].mxu0  ;;  %3548 = vmatpush1.bf16.msra.mxu1 %v3547_v49 }
 0x49e   :  { %v1682_v52 = vadd.f32 %v3119_v50, %v4515_v18  ;;  %v1570_v53 = vpop.f32.mrb[79].mxu0  ;;  %3549 = vmatprep.subr.bf16.mxu1 %v4738_v38 }
 0x49f   :  { %v1681_v51 = vadd.f32 %v4515_v18, %v1570_v53 }
 0x4a0   :  { %v1714_v55 = vmax.f32 %v1682_v52, 0.0 }
 0x4a1   :  { %v1713_v57 = vmax.f32 %v1681_v51, 0.0 }
 0x4a3   :  { %v3550_v58 = vpack.c.bf16 %v1714_v55, %v1713_v57  ;;  %3197 = vmatprep.mubr.f32.mxu0 %v1713_v57 }
 0x4a4   :  { %3198 = vmatmul.mubr.f32.gmra.mrb[110].mxu0 %v1714_v55 }
 0x4a5   :  { %v3122_v60 = vpop.f32.mrb[80].mxu0  ;;  %3551 = vmatpush1.bf16.msra.mxu1 %v3550_v58 }
 0x4a6   :  { %v1684_v61 = vadd.f32 %v3122_v60, %v4515_v18  ;;  %v1580_v62 = vpop.f32.mrb[81].mxu0  ;;  %3552 = vmatprep.subr.bf16.mxu1 %v4738_v38 }
 0x4a7   :  { %v1683_v63 = vadd.f32 %v4515_v18, %v1580_v62 }
 0x4a8   :  { %v1716_v1 = vmax.f32 %v1684_v61, 0.0 }
 0x4a9   :  { %v1715_v4 = vmax.f32 %v1683_v63, 0.0 }
 0x4ab   :  { %v3553_v6 = vpack.c.bf16 %v1716_v1, %v1715_v4  ;;  %3200 = vmatprep.mubr.f32.mxu0 %v1715_v4 }
 0x4ac   :  { %3201 = vmatmul.mubr.f32.gmra.mrb[112].mxu0 %v1716_v1 }
 0x4ad   :  { %v3125_v9 = vpop.f32.mrb[82].mxu0  ;;  %3554 = vmatpush1.bf16.msra.mxu1 %v3553_v6 }
 0x4ae   :  { %v1686_v40 = vadd.f32 %v3125_v9, %v4515_v18  ;;  %v1590_v5 = vpop.f32.mrb[83].mxu0  ;;  %3555 = vmatprep.subr.bf16.mxu1 %v4738_v38 }
 0x4af   :  { %v1685_v28 = vadd.f32 %v4515_v18, %v1590_v5 }
 0x4b0   :  { %v1718_v8 = vmax.f32 %v1686_v40, 0.0 }
 0x4b1   :  { %v1717_v10 = vmax.f32 %v1685_v28, 0.0 }
 0x4b3   :  { %v3556_v11 = vpack.c.bf16 %v1718_v8, %v1717_v10  ;;  %3203 = vmatprep.mubr.f32.mxu0 %v1717_v10 }
 0x4b4   :  { %3204 = vmatmul.mubr.f32.gmra.mrb[114].mxu0 %v1718_v8 }
 0x4b5   :  { %v3128_v14 = vpop.f32.mrb[84].mxu0  ;;  %3557 = vmatpush1.bf16.msra.mxu1 %v3556_v11 }
 0x4b6   :  { %v1688_v17 = vadd.f32 %v3128_v14, %v4515_v18  ;;  %v1600_v20 = vpop.f32.mrb[85].mxu0  ;;  %3558 = vmatprep.subr.bf16.mxu1 %v4738_v38 }
 0x4b7   :  { %v1687_v21 = vadd.f32 %v4515_v18, %v1600_v20 }
 0x4b8   :  { %v1720_v23 = vmax.f32 %v1688_v17, 0.0 }
 0x4b9   :  { %v1719_v24 = vmax.f32 %v1687_v21, 0.0 }
 0x4bb   :  { %v3559_v26 = vpack.c.bf16 %v1720_v23, %v1719_v24  ;;  %3206 = vmatprep.mubr.f32.mxu0 %v1719_v24 }
 0x4bc   :  { %3207 = vmatmul.mubr.f32.gmra.mrb[116].mxu0 %v1720_v23 }
 0x4bd   :  { %v3131_v27 = vpop.f32.mrb[86].mxu0  ;;  %3560 = vmatpush1.bf16.msra.mxu1 %v3559_v26  ;;  %v3781_v26 = vld [vmem:[#allocation2 + $0x90] sm:$0xff] }
 0x4be   :  { %v1690_v30 = vadd.f32 %v3131_v27, %v4515_v18  ;;  %v1610_v32 = vpop.f32.mrb[87].mxu0  ;;  %3561 = vmatprep.subr.bf16.mxu1 %v4738_v38  ;;  %v3784_v27 = vld [vmem:[#allocation2 + $0xb8] sm:$0xff] }
 0x4bf   :  { %v1689_v33 = vadd.f32 %v4515_v18, %v1610_v32  ;;  %v3788_v32 = vld [vmem:[#allocation2 + $0xd8] sm:$0xff] }
 0x4c0   :  { %v1722_v35 = vmax.f32 %v1690_v30, 0.0  ;;  %v3787_v30 = vld [vmem:[#allocation2 + $0xc0] sm:$0xff] }
 0x4c1   :  { %v1721_v39 = vmax.f32 %v1689_v33, 0.0  ;;  %v3789_v33 = vld [vmem:[#allocation2 + $0xd0] sm:$0xff] }
 0x4c3   :  { %v3562_v41 = vpack.c.bf16 %v1722_v35, %v1721_v39  ;;  %3209 = vmatprep.mubr.f32.mxu0 %v1721_v39  ;;  %v3791_v39 = vld [vmem:[#allocation2 + $0xe0] sm:$0xff] }
 0x4c4   :  { %3210 = vmatmul.mubr.f32.gmra.mrb[118].mxu0 %v1722_v35  ;;  %v3790_v35 = vld [vmem:[#allocation2 + $0xe8] sm:$0xff] }
 0x4c5   :  { %v3134_v49 = vpop.f32.mrb[88].mxu0  ;;  %3563 = vmatpush1.bf16.msra.mxu1 %v3562_v41  ;;  %v3792_v41 = vld [vmem:[#allocation2 + $0xf8] sm:$0xff] }
 0x4c6   :  { %v4553_v50 = vadd.f32 %v3134_v49, %v4515_v18  ;;  %v1620_v52 = vpop.f32.mrb[89].mxu0  ;;  %3564 = vmatprep.subr.bf16.mxu1 %v4738_v38  ;;  %v3793_v49 = vld [vmem:[#allocation2 + $0xf0] sm:$0xff] }
 0x4c7   :  { %v4557_v53 = vadd.f32 %v4515_v18, %v1620_v52  ;;  %v3794_v52 = vld [vmem:[#allocation2 + $0x108] sm:$0xff] }
 0x4c8   :  { %v1724_v51 = vmax.f32 %v4553_v50, 0.0 }
 0x4c9   :  { %v1723_v55 = vmax.f32 %v4557_v53, 0.0 }
 0x4cb   :  { %v3565_v57 = vpack.c.bf16 %v1724_v51, %v1723_v55 }
 0x4cd   :  { %v3137_v58 = vpop.f32.mrb[90].mxu0  ;;  %3566 = vmatpush1.bf16.msra.mxu1 %v3565_v57  ;;  %v3795_v57 = vld [vmem:[#allocation2 + $0x100] sm:$0xff] }
 0x4ce   :  { %v4566_v60 = vadd.f32 %v3137_v58, %v4515_v18  ;;  %v1630_v61 = vpop.f32.mrb[91].mxu0  ;;  %3567 = vmatprep.subr.bf16.mxu1 %v4738_v38  ;;  %v3796_v58 = vld [vmem:[#allocation2 + $0x118] sm:$0xff] }
 0x4cf   :  { %v4570_v62 = vadd.f32 %v4515_v18, %v1630_v61  ;;  %v3797_v61 = vld [vmem:[#allocation2 + $0x110] sm:$0xff] }
 0x4d0   :  { %v1726_v63 = vmax.f32 %v4566_v60, 0.0 }
 0x4d1   :  { %v1725_v1 = vmax.f32 %v4570_v62, 0.0 }
 0x4d3   :  { %v3568_v4 = vpack.c.bf16 %v1726_v63, %v1725_v1 }
 0x4d5   :  { %v3140_v6 = vpop.f32.mrb[92].mxu0  ;;  %3569 = vmatpush1.bf16.msra.mxu1 %v3568_v4  ;;  %v3798_v4 = vld [vmem:[#allocation2 + $0x128] sm:$0xff] }
 0x4d6   :  { %v4579_v9 = vadd.f32 %v3140_v6, %v4515_v18  ;;  %v1640_v40 = vpop.f32.mrb[93].mxu0  ;;  %3570 = vmatprep.subr.bf16.mxu1 %v4738_v38  ;;  %v3799_v6 = vld [vmem:[#allocation2 + $0x120] sm:$0xff] }
 0x4d7   :  { %v4583_v5 = vadd.f32 %v4515_v18, %v1640_v40  ;;  %v3800_v40 = vld [vmem:[#allocation2 + $0x138] sm:$0xff] }
 0x4d8   :  { %v1728_v28 = vmax.f32 %v4579_v9, 0.0 }
 0x4d9   :  { %v1727_v8 = vmax.f32 %v4583_v5, 0.0 }
 0x4db   :  { %v3571_v10 = vpack.c.bf16 %v1728_v28, %v1727_v8 }
 0x4dd   :  { %v3143_v11 = vpop.f32.mrb[94].mxu0  ;;  %3572 = vmatpush1.bf16.msra.mxu1 %v3571_v10  ;;  %v3801_v10 = vld [vmem:[#allocation2 + $0x130] sm:$0xff] }
 0x4de   :  { %v4592_v14 = vadd.f32 %v3143_v11, %v4515_v18  ;;  %v1650_v17 = vpop.f32.mrb[95].mxu0  ;;  %3573 = vmatprep.subr.bf16.mxu1 %v4738_v38  ;;  %v1972_v38 = vld [vmem:[#allocation7 + $0x178] sm:$0xff]  ;;  %v3802_v11 = vld [vmem:[#allocation2 + $0x148] sm:$0xff] }
 0x4df   :  { %v4596_v20 = vadd.f32 %v4515_v18, %v1650_v17  ;;  %v1970_v18 = vld [vmem:[#allocation7 + $0x168] sm:$0xff]  ;;  %v3803_v17 = vld [vmem:[#allocation2 + $0x140] sm:$0xff] }
 0x4e0   :  { %v1730_v21 = vmax.f32 %v4592_v14, 0.0 }
 0x4e1   :  { %v1729_v23 = vmax.f32 %v4596_v20, 0.0 }
 0x4e3   :  { %v3574_v24 = vpack.c.bf16 %v1730_v21, %v1729_v23 }
 0x4e5   :  { %3575 = vmatpush1.bf16.msra.mxu1 %v3574_v24  ;;  %v3804_v24 = vld [vmem:[#allocation2 + $0x158] sm:$0xff] }
 0x4e6   :  { %3640 = vmatprep.subr.bf16.mxu1 %v4480_v15 }
 0x4e8   :  { %1796 = vmatmul.mubr.f32.vlgmr.msra.gmra.mrb[96].mxu1 %v4381_v34  ;;  %v1957_v34 = vld [vmem:[#allocation7 + $0x100] sm:$0xff] }
 0x4e9   :  { %1800 = vmatprep.mubr.f32.mxu1 %v4384_v31  ;;  %3648 = vmatpush3.bf16.msra.mxu1 %v4480_v15  ;;  %v1958_v31 = vld [vmem:[#allocation7 + $0x108] sm:$0xff]  ;;  %v1959_v15 = vld [vmem:[#allocation7 + $0x110] sm:$0xff] }
 0x4ea   :  { %3641 = vmatprep.subr.bf16.mxu1 %v4483_v47 }
 0x4ec   :  { %1801 = vmatmul.mubr.f32.gmra.mrb[98].mxu1 %v4387_v3  ;;  %v3608_v3 = vpack.c.bf16 %v1958_v31, %v1957_v34  ;;  %v3805_v34 = vld [vmem:[#allocation2 + $0x150] sm:$0xff]  ;;  %v3806_v31 = vld [vmem:[#allocation2 + $0x168] sm:$0xff] }
 0x4ed   :  { %1805 = vmatprep.mubr.f32.mxu1 %v4390_v42  ;;  %3649 = vmatpush3.bf16.msra.mxu1 %v4483_v47  ;;  %v1960_v42 = vld [vmem:[#allocation7 + $0x118] sm:$0xff]  ;;  %v1962_v47 = vld [vmem:[#allocation7 + $0x128] sm:$0xff] }
 0x4ee   :  { %3642 = vmatprep.subr.bf16.mxu1 %v4487_v29  ;;  %3609 = vmatprep.subr.bf16.mxu0 %v3608_v3 }
 0x4ef   :  { %3611 = vmatpush3.bf16.msra.mxu0 %v3608_v3  ;;  %v3808_v3 = vld [vmem:[#allocation2 + $0x178] sm:$0xff] }
 0x4f0   :  { %1806 = vmatmul.mubr.f32.gmra.mrb[100].mxu1 %v4393_v16  ;;  %v3612_v16 = vpack.c.bf16 %v1960_v42, %v1959_v15  ;;  %v3807_v15 = vld [vmem:[#allocation2 + $0x160] sm:$0xff]  ;;  %v3809_v42 = vld [vmem:[#allocation2 + $0x170] sm:$0xff] }
 0x4f1   :  { %1810 = vmatprep.mubr.f32.mxu1 %v4396_v43  ;;  %3650 = vmatpush3.bf16.msra.mxu1 %v4487_v29  ;;  %v1961_v43 = vld [vmem:[#allocation7 + $0x120] sm:$0xff]  ;;  %v1964_v29 = vld [vmem:[#allocation7 + $0x138] sm:$0xff] }
 0x4f2   :  { %3643 = vmatprep.subr.bf16.mxu1 %v4491_v36  ;;  %3613 = vmatprep.subr.bf16.mxu0 %v3612_v16 }
 0x4f3   :  { %3615 = vmatpush3.bf16.msra.mxu0 %v3612_v16  ;;  %v3810_v16 = vld [vmem:[#allocation2 + $0x188] sm:$0xff] }
 0x4f4   :  { %1811 = vmatmul.mubr.f32.gmra.mrb[102].mxu1 %v4399_v48  ;;  %v3616_v48 = vpack.c.bf16 %v1962_v47, %v1961_v43  ;;  %v3811_v43 = vld [vmem:[#allocation2 + $0x180] sm:$0xff]  ;;  %v3812_v47 = vld [vmem:[#allocation2 + $0x198] sm:$0xff] }
 0x4f5   :  { %1815 = vmatprep.mubr.f32.mxu1 %v4402_v2  ;;  %3651 = vmatpush3.bf16.msra.mxu1 %v4491_v36  ;;  %v1963_v2 = vld [vmem:[#allocation7 + $0x130] sm:$0xff]  ;;  %v1966_v36 = vld [vmem:[#allocation7 + $0x148] sm:$0xff] }
 0x4f6   :  { %3644 = vmatprep.subr.bf16.mxu1 %v4495_v45  ;;  %3617 = vmatprep.subr.bf16.mxu0 %v3616_v48 }
 0x4f7   :  { %3619 = vmatpush3.bf16.msra.mxu0 %v3616_v48  ;;  %v3813_v48 = vld [vmem:[#allocation2 + $0x190] sm:$0xff] }
 0x4f8   :  { %1816 = vmatmul.mubr.f32.gmra.mrb[104].mxu1 %v4405_v46  ;;  %v3620_v46 = vpack.c.bf16 %v1964_v29, %v1963_v2  ;;  %v3814_v2 = vld [vmem:[#allocation2 + $0x1a8] sm:$0xff]  ;;  %v3815_v29 = vld [vmem:[#allocation2 + $0x1a0] sm:$0xff] }
 0x4f9   :  { %1820 = vmatprep.mubr.f32.mxu1 %v4408_v12  ;;  %3652 = vmatpush3.bf16.msra.mxu1 %v4495_v45  ;;  %v1965_v12 = vld [vmem:[#allocation7 + $0x140] sm:$0xff]  ;;  %v1968_v45 = vld [vmem:[#allocation7 + $0x158] sm:$0xff] }
 0x4fa   :  { %3645 = vmatprep.subr.bf16.mxu1 %v4499_v54  ;;  %3621 = vmatprep.subr.bf16.mxu0 %v3620_v46 }
 0x4fb   :  { %3623 = vmatpush3.bf16.msra.mxu0 %v3620_v46  ;;  %v3816_v46 = vld [vmem:[#allocation2 + $0x1b8] sm:$0xff] }
 0x4fc   :  { %1821 = vmatmul.mubr.f32.gmra.mrb[106].mxu1 %v4411_v7  ;;  %v3624_v7 = vpack.c.bf16 %v1966_v36, %v1965_v12  ;;  %v3817_v12 = vld [vmem:[#allocation2 + $0x1b0] sm:$0xff]  ;;  %v3818_v36 = vld [vmem:[#allocation2 + $0x1c8] sm:$0xff] }
 0x4fd   :  { %1825 = vmatprep.mubr.f32.mxu1 %v4414_v0  ;;  %3653 = vmatpush3.bf16.msra.mxu1 %v4499_v54  ;;  %v1967_v0 = vld [vmem:[#allocation7 + $0x150] sm:$0xff] }
 0x4fe   :  { %3646 = vmatprep.subr.bf16.mxu1 %v4503_v59  ;;  %v3628_v54 = vpack.c.bf16 %v1968_v45, %v1967_v0  ;;  %3625 = vmatprep.subr.bf16.mxu0 %v3624_v7  ;;  %v3820_v0 = vld [vmem:[#allocation2 + $0x1d8] sm:$0xff]  ;;  %v3821_v45 = vld [vmem:[#allocation2 + $0x1d0] sm:$0xff] }
 0x4ff   :  { %3627 = vmatpush3.bf16.msra.mxu0 %v3624_v7  ;;  %v3819_v7 = vld [vmem:[#allocation2 + $0x1c0] sm:$0xff] }
 0x500   :  { %1826 = vmatmul.mubr.f32.gmra.mrb[108].mxu1 %v4417_v44  ;;  %v1969_v44 = vld [vmem:[#allocation7 + $0x160] sm:$0xff]  ;;  %3629 = vmatprep.subr.bf16.mxu0 %v3628_v54 }
 0x501   :  { %1830 = vmatprep.mubr.f32.mxu1 %v4420_v37  ;;  %3654 = vmatpush3.bf16.msra.mxu1 %v4503_v59  ;;  %v3632_v37 = vpack.c.bf16 %v1970_v18, %v1969_v44  ;;  %v1971_v59 = vld [vmem:[#allocation7 + $0x170] sm:$0xff]  ;;  %v3823_v44 = vld [vmem:[#allocation2 + $0x1e0] sm:$0xff]  ;;  %v3824_v18 = vld [vmem:[#allocation2 + $0x1f8] sm:$0xff] }
 0x502   :  { %3647 = vmatprep.subr.bf16.mxu1 %v4508_v56 }
 0x503   :  { %3631 = vmatpush3.bf16.msra.mxu0 %v3628_v54  ;;  %v3822_v54 = vld [vmem:[#allocation2 + $0x1e8] sm:$0xff] }
 0x504   :  { %1831 = vmatmul.mubr.f32.gmra.mrb[110].mxu1 %v4423_v13  ;;  %v3782_v13 = vld [vmem:[#allocation2 + $0xa8] sm:$0xff]  ;;  %3633 = vmatprep.subr.bf16.mxu0 %v3632_v37 }
 0x505   :  { %1835 = vmatprep.mubr.f32.mxu1 %v4426_v25  ;;  %3655 = vmatpush3.bf16.msra.mxu1 %v4508_v56  ;;  %v3636_v25 = vpack.c.bf16 %v1972_v38, %v1971_v59  ;;  %v3783_v56 = vld [vmem:[#allocation2 + $0xa0] sm:$0xff] }
 0x507   :  { %3635 = vmatpush3.bf16.msra.mxu0 %v3632_v37  ;;  %v3825_v37 = vld [vmem:[#allocation2 + $0x1f0] sm:$0xff] }
 0x508   :  { %1836 = vmatmul.mubr.f32.gmra.mrb[112].mxu1 %v4429_v19  ;;  %3637 = vmatprep.subr.bf16.mxu0 %v3636_v25  ;;  %v3785_v19 = vld [vmem:[#allocation2 + $0xb0] sm:$0xff] }
 0x509   :  { %1840 = vmatprep.mubr.f32.mxu1 %v4432_v22  ;;  %v3786_v22 = vld [vmem:[#allocation2 + $0xc8] sm:$0xff] }
 0x50b   :  { %3639 = vmatpush3.bf16.msra.mxu0 %v3636_v25 }
 0x50c   :  { %1841 = vmatmul.mubr.f32.gmra.mrb[114].mxu1 %v3781_v26 }
 0x50d   :  { %1845 = vmatprep.mubr.f32.mxu1 %v3782_v13 }
 0x510   :  { %1846 = vmatmul.mubr.f32.gmra.mrb[116].mxu1 %v3783_v56 }
 0x511   :  { %1850 = vmatprep.mubr.f32.mxu1 %v3784_v27 }
 0x514   :  { %1851 = vmatmul.mubr.f32.gmra.mrb[118].mxu1 %v3785_v19 }
 0x515   :  { %1855 = vmatprep.mubr.f32.mxu1 %v3786_v22 }
 0x518   :  { %1856 = vmatmul.mubr.f32.gmra.mrb[120].mxu1 %v3787_v30 }
 0x519   :  { %1860 = vmatprep.mubr.f32.mxu1 %v3788_v32 }
 0x51c   :  { %1861 = vmatmul.mubr.f32.gmra.mrb[122].mxu1 %v3789_v33 }
 0x51d   :  { %1865 = vmatprep.mubr.f32.mxu1 %v3790_v35 }
 0x520   :  { %1866 = vmatmul.mubr.f32.gmra.mrb[124].mxu1 %v3791_v39 }
 0x521   :  { %1870 = vmatprep.mubr.f32.mxu1 %v3792_v41 }
 0x524   :  { %1871 = vmatmul.mubr.f32.gmra.mrb[126].mxu1 %v3793_v49 }
 0x525   :  { %1875 = vmatprep.mubr.f32.mxu1 %v3794_v52 }
 0x528   :  { %1876 = vmatmul.mubr.f32.gmra.mrb[128].mxu1 %v3795_v57 }
 0x529   :  { %1880 = vmatprep.mubr.f32.mxu1 %v3796_v58 }
 0x52c   :  { %1881 = vmatmul.mubr.f32.gmra.mrb[130].mxu1 %v3797_v61 }
 0x52d   :  { %1885 = vmatprep.mubr.f32.mxu1 %v3798_v4 }
 0x530   :  { %1886 = vmatmul.mubr.f32.gmra.mrb[132].mxu1 %v3799_v6 }
 0x531   :  { %1890 = vmatprep.mubr.f32.mxu1 %v3800_v40 }
 0x534   :  { %1891 = vmatmul.mubr.f32.gmra.mrb[134].mxu1 %v3801_v10 }
 0x535   :  { %1895 = vmatprep.mubr.f32.mxu1 %v3802_v11 }
 0x538   :  { %1896 = vmatmul.mubr.f32.gmra.mrb[136].mxu1 %v3803_v17 }
 0x539   :  { %1900 = vmatprep.mubr.f32.mxu1 %v3804_v24 }
 0x53c   :  { %1901 = vmatmul.mubr.f32.gmra.mrb[138].mxu1 %v3805_v34 }
 0x53d   :  { %1905 = vmatprep.mubr.f32.mxu1 %v3806_v31 }
 0x540   :  { %1906 = vmatmul.mubr.f32.gmra.mrb[140].mxu1 %v3807_v15 }
 0x541   :  { %1910 = vmatprep.mubr.f32.mxu1 %v3808_v3 }
 0x544   :  { %1911 = vmatmul.mubr.f32.gmra.mrb[142].mxu1 %v3809_v42 }
 0x545   :  { %1915 = vmatprep.mubr.f32.mxu1 %v3810_v16 }
 0x548   :  { %1916 = vmatmul.mubr.f32.gmra.mrb[144].mxu1 %v3811_v43 }
 0x549   :  { %1920 = vmatprep.mubr.f32.mxu1 %v3812_v47 }
 0x54c   :  { %1921 = vmatmul.mubr.f32.gmra.mrb[146].mxu1 %v3813_v48 }
 0x54d   :  { %1925 = vmatprep.mubr.f32.mxu1 %v3814_v2 }
 0x550   :  { %1926 = vmatmul.mubr.f32.gmra.mrb[148].mxu1 %v3815_v29 }
 0x551   :  { %1930 = vmatprep.mubr.f32.mxu1 %v3816_v46 }
 0x554   :  { %1931 = vmatmul.mubr.f32.gmra.mrb[150].mxu1 %v3817_v12 }
 0x555   :  { %1935 = vmatprep.mubr.f32.mxu1 %v3818_v36 }
 0x558   :  { %1936 = vmatmul.mubr.f32.gmra.mrb[152].mxu1 %v3819_v7 }
 0x559   :  { %1940 = vmatprep.mubr.f32.mxu1 %v3820_v0 }
 0x55c   :  { %1941 = vmatmul.mubr.f32.gmra.mrb[154].mxu1 %v3821_v45 }
 0x55d   :  { %1945 = vmatprep.mubr.f32.mxu1 %v3822_v54 }
 0x560   :  { %1946 = vmatmul.mubr.f32.gmra.mrb[156].mxu1 %v3823_v44 }
 0x561   :  { %1950 = vmatprep.mubr.f32.mxu1 %v3824_v18 }
 0x564   :  { %1951 = vmatmul.mubr.f32.gmra.mrb[158].mxu1 %v3825_v37 }
 0x565   :  { %3212 = vmatprep.mubr.f32.mxu1 %v1723_v55 }
 0x568   :  { %3213 = vmatmul.mubr.f32.vlgmr.msra.gmra.mrb[160].mxu1 %v1724_v51 }
 0x569   :  { %3215 = vmatprep.mubr.f32.mxu1 %v1725_v1 }
 0x56c   :  { %3216 = vmatmul.mubr.f32.gmra.mrb[162].mxu1 %v1726_v63 }
 0x56d   :  { %3218 = vmatprep.mubr.f32.mxu1 %v1727_v8 }
 0x570   :  { %3219 = vmatmul.mubr.f32.gmra.mrb[164].mxu1 %v1728_v28 }
 0x571   :  { %3221 = vmatprep.mubr.f32.mxu1 %v1729_v23 }
 0x574   :  { %3222 = vmatmul.mubr.f32.gmra.mrb[166].mxu1 %v1730_v21 }
 0x5bb   :  { %v1797_v50 = vpop.f32.mrb[96].mxu1 }
 0x5bc   :  { %v1799_v53 = vpop.f32.mrb[97].mxu1  ;;  %3256 = vmatprep.mubr.f32.mxu0 %v1797_v50 }
 0x5bf   :  { %v1802_v51 = vpop.f32.mrb[98].mxu1 }
 0x5c0   :  { %3257 = vmatmul.mubr.f32.vlgmr.msra.gmra.mrb[96].mxu0 %v1802_v51  ;;  %v1804_v55 = vpop.f32.mrb[99].mxu1 }
 0x5c3   :  { %v1807_v60 = vpop.f32.mrb[100].mxu1 }
 0x5c4   :  { %v1809_v62 = vpop.f32.mrb[101].mxu1  ;;  %3259 = vmatprep.mubr.f32.mxu0 %v1807_v60 }
 0x5c7   :  { %v1812_v63 = vpop.f32.mrb[102].mxu1 }
 0x5c8   :  { %3260 = vmatmul.mubr.f32.gmra.mrb[98].mxu0 %v1812_v63  ;;  %v1814_v1 = vpop.f32.mrb[103].mxu1 }
 0x5cb   :  { %v1817_v9 = vpop.f32.mrb[104].mxu1 }
 0x5cc   :  { %v1819_v5 = vpop.f32.mrb[105].mxu1  ;;  %3262 = vmatprep.mubr.f32.mxu0 %v1817_v9  ;;  %v4673_v9 = vld [vmem:[%s4734_s4 + $0x2] ss:$0 sm:$0xff]  ;;  %s3953_s4 = smov [#allocation10]  }
 0x5cd   :  { %s2517_s23 = sshll.u32 %s3953_s4, 4  ;;  %s2518_s23 = int_to_ptr.vmem [resolvable:$true] %s2517_s23 }
 0x5ce   :  { %s3914_s24 = scalar_lea.vmem %s2518_s23, 4096  ;;  %p3919_p5 = scmp.lt.s32.totalorder %s2518_s23, %s2518_s23 }
 0x5cf   :  { %v1822_v28 = vpop.f32.mrb[106].mxu1  ;;  %p3915_p4 = scmp.ne.s32.totalorder %s2518_s23, %s3914_s24  ;;  %p3920_p6 = scmp.lt.s32.totalorder %s3914_s24, %s3914_s24 }
 0x5d0   :  { %3263 = vmatmul.mubr.f32.gmra.mrb[100].mxu0 %v1822_v28  ;;  %v1824_v8 = vpop.f32.mrb[107].mxu1 }
 0x5d1   :  { %p3921_p7 = por %p3920_p6, %p3919_p5 }
 0x5d3   :  { %v1827_v14 = vpop.f32.mrb[108].mxu1  ;;  %p3922_p8 = pnand %p3921_p7, %p3915_p4 }
 0x5d4   :  { %v1829_v20 = vpop.f32.mrb[109].mxu1  ;;  %3265 = vmatprep.mubr.f32.mxu0 %v1827_v14 }
 0x5d7   :  { %v1832_v21 = vpop.f32.mrb[110].mxu1 }
 0x5d8   :  { %3266 = vmatmul.mubr.f32.gmra.mrb[102].mxu0 %v1832_v21  ;;  %v1834_v23 = vpop.f32.mrb[111].mxu1 }
 0x5db   :  { %v1837_v59 = vpop.f32.mrb[112].mxu1 }
 0x5dc   :  { %v1839_v38 = vpop.f32.mrb[113].mxu1  ;;  %3268 = vmatprep.mubr.f32.mxu0 %v1837_v59 }
 0x5df   :  { %v1842_v26 = vpop.f32.mrb[114].mxu1 }
 0x5e0   :  { %3269 = vmatmul.mubr.f32.gmra.mrb[104].mxu0 %v1842_v26  ;;  %v1844_v13 = vpop.f32.mrb[115].mxu1 }
 0x5e3   :  { %v1847_v25 = vpop.f32.mrb[116].mxu1 }
 0x5e4   :  { %v1849_v56 = vpop.f32.mrb[117].mxu1  ;;  %3271 = vmatprep.mubr.f32.mxu0 %v1847_v25 }
 0x5e7   :  { %v1852_v27 = vpop.f32.mrb[118].mxu1 }
 0x5e8   :  { %3272 = vmatmul.mubr.f32.gmra.mrb[106].mxu0 %v1852_v27  ;;  %v1854_v19 = vpop.f32.mrb[119].mxu1 }
 0x5eb   :  { %v1857_v22 = vpop.f32.mrb[120].mxu1 }
 0x5ec   :  { %v1859_v30 = vpop.f32.mrb[121].mxu1  ;;  %3274 = vmatprep.mubr.f32.mxu0 %v1857_v22 }
 0x5ef   :  { %v1862_v32 = vpop.f32.mrb[122].mxu1 }
 0x5f0   :  { %3275 = vmatmul.mubr.f32.gmra.mrb[108].mxu0 %v1862_v32  ;;  %v1864_v33 = vpop.f32.mrb[123].mxu1 }
 0x5f3   :  { %v1867_v35 = vpop.f32.mrb[124].mxu1 }
 0x5f4   :  { %v1869_v39 = vpop.f32.mrb[125].mxu1  ;;  %3277 = vmatprep.mubr.f32.mxu0 %v1867_v35 }
 0x5f7   :  { %v1872_v41 = vpop.f32.mrb[126].mxu1 }
 0x5f8   :  { %3278 = vmatmul.mubr.f32.gmra.mrb[110].mxu0 %v1872_v41  ;;  %v1874_v49 = vpop.f32.mrb[127].mxu1 }
 0x5fb   :  { %v1877_v52 = vpop.f32.mrb[128].mxu1 }
 0x5fc   :  { %v1879_v57 = vpop.f32.mrb[129].mxu1  ;;  %3280 = vmatprep.mubr.f32.mxu0 %v1877_v52 }
 0x5ff   :  { %v1882_v58 = vpop.f32.mrb[130].mxu1 }
 0x600   :  { %3281 = vmatmul.mubr.f32.gmra.mrb[112].mxu0 %v1882_v58  ;;  %v1884_v61 = vpop.f32.mrb[131].mxu1 }
 0x603   :  { %v1887_v4 = vpop.f32.mrb[132].mxu1 }
 0x604   :  { %v1889_v6 = vpop.f32.mrb[133].mxu1  ;;  %3283 = vmatprep.mubr.f32.mxu0 %v1887_v4 }
 0x607   :  { %v1892_v40 = vpop.f32.mrb[134].mxu1 }
 0x608   :  { %3284 = vmatmul.mubr.f32.gmra.mrb[114].mxu0 %v1892_v40  ;;  %v1894_v10 = vpop.f32.mrb[135].mxu1 }
 0x60b   :  { %v1897_v11 = vpop.f32.mrb[136].mxu1 }
 0x60c   :  { %v1899_v17 = vpop.f32.mrb[137].mxu1  ;;  %3286 = vmatprep.mubr.f32.mxu0 %v1897_v11 }
 0x60f   :  { %v1902_v24 = vpop.f32.mrb[138].mxu1 }
 0x610   :  { %3287 = vmatmul.mubr.f32.gmra.mrb[116].mxu0 %v1902_v24  ;;  %v1904_v34 = vpop.f32.mrb[139].mxu1 }
 0x613   :  { %v1907_v31 = vpop.f32.mrb[140].mxu1 }
 0x614   :  { %v1909_v15 = vpop.f32.mrb[141].mxu1  ;;  %3289 = vmatprep.mubr.f32.mxu0 %v1907_v31 }
 0x617   :  { %v1912_v3 = vpop.f32.mrb[142].mxu1 }
 0x618   :  { %3290 = vmatmul.mubr.f32.gmra.mrb[118].mxu0 %v1912_v3  ;;  %v1914_v42 = vpop.f32.mrb[143].mxu1 }
 0x61b   :  { %v1917_v16 = vpop.f32.mrb[144].mxu1 }
 0x61c   :  { %v1919_v43 = vpop.f32.mrb[145].mxu1  ;;  %3292 = vmatprep.mubr.f32.mxu0 %v1917_v16 }
 0x61f   :  { %v1922_v47 = vpop.f32.mrb[146].mxu1 }
 0x620   :  { %3293 = vmatmul.mubr.f32.gmra.mrb[120].mxu0 %v1922_v47  ;;  %v1924_v48 = vpop.f32.mrb[147].mxu1 }
 0x623   :  { %v1927_v2 = vpop.f32.mrb[148].mxu1 }
 0x624   :  { %v1929_v29 = vpop.f32.mrb[149].mxu1  ;;  %3295 = vmatprep.mubr.f32.mxu0 %v1927_v2 }
 0x627   :  { %v1932_v46 = vpop.f32.mrb[150].mxu1 }
 0x628   :  { %3296 = vmatmul.mubr.f32.gmra.mrb[122].mxu0 %v1932_v46  ;;  %v1934_v12 = vpop.f32.mrb[151].mxu1 }
 0x62b   :  { %v1937_v36 = vpop.f32.mrb[152].mxu1 }
 0x62c   :  { %v1939_v7 = vpop.f32.mrb[153].mxu1  ;;  %3298 = vmatprep.mubr.f32.mxu0 %v1937_v36 }
 0x62f   :  { %v1942_v0 = vpop.f32.mrb[154].mxu1 }
 0x630   :  { %3299 = vmatmul.mubr.f32.gmra.mrb[124].mxu0 %v1942_v0  ;;  %v1944_v45 = vpop.f32.mrb[155].mxu1 }
 0x633   :  { %v1947_v54 = vpop.f32.mrb[156].mxu1 }
 0x634   :  { %v1949_v44 = vpop.f32.mrb[157].mxu1  ;;  %3301 = vmatprep.mubr.f32.mxu0 %v1947_v54 }
 0x637   :  { %v1952_v18 = vpop.f32.mrb[158].mxu1 }
 0x638   :  { %3302 = vmatmul.mubr.f32.gmra.mrb[126].mxu0 %v1952_v18  ;;  %v1954_v37 = vpop.f32.mrb[159].mxu1 }
 0x63b   :  { %v4654_v50 = vpop.f32.mrb[160].mxu1 }
 0x63c   :  { %v4656_v53 = vpop.f32.mrb[161].mxu1 }
 0x63f   :  { %v4658_v51 = vpop.f32.mrb[162].mxu1 }
 0x640   :  { %v4660_v55 = vpop.f32.mrb[163].mxu1 }
 0x643   :  { %v4662_v60 = vpop.f32.mrb[164].mxu1 }
 0x644   :  { %v4664_v62 = vpop.f32.mrb[165].mxu1 }
 0x647   :  { %v4666_v63 = vpop.f32.mrb[166].mxu1 }
 0x648   :  { %v4668_v1 = vpop.f32.mrb[167].mxu1 }
 0x693   :  { %v3258_v5 = vpop.f32.mrb[96].mxu0 }
 0x694   :  { %v2449_v28 = vadd.f32 %v3258_v5, %v4673_v9  ;;  %v2281_v8 = vpop.f32.mrb[97].mxu0 }
 0x695   :  { %v2448_v14 = vadd.f32 %v4673_v9, %v2281_v8 }
 0x696   :  { %2481 = vst [vmem:[#allocation10 + $0x8] sm:$0xff] %v2449_v28 }
 0x697   :  { %2480 = vst [vmem:[#allocation10] sm:$0xff] %v2448_v14 }
 0x69b   :  { %v3261_v20 = vpop.f32.mrb[98].mxu0 }
 0x69c   :  { %v2451_v21 = vadd.f32 %v3261_v20, %v4673_v9  ;;  %v2291_v23 = vpop.f32.mrb[99].mxu0 }
 0x69d   :  { %v2450_v59 = vadd.f32 %v4673_v9, %v2291_v23 }
 0x69e   :  { %2483 = vst [vmem:[#allocation10 + $0x18] sm:$0xff] %v2451_v21 }
 0x69f   :  { %2482 = vst [vmem:[#allocation10 + $0x10] sm:$0xff] %v2450_v59 }
 0x6a3   :  { %v3264_v38 = vpop.f32.mrb[100].mxu0 }
 0x6a4   :  { %v2453_v26 = vadd.f32 %v3264_v38, %v4673_v9  ;;  %v2301_v13 = vpop.f32.mrb[101].mxu0 }
 0x6a5   :  { %v2452_v25 = vadd.f32 %v4673_v9, %v2301_v13 }
 0x6a6   :  { %2485 = vst [vmem:[#allocation10 + $0x28] sm:$0xff] %v2453_v26 }
 0x6a7   :  { %2484 = vst [vmem:[#allocation10 + $0x20] sm:$0xff] %v2452_v25 }
 0x6ab   :  { %v3267_v56 = vpop.f32.mrb[102].mxu0 }
 0x6ac   :  { %v2455_v27 = vadd.f32 %v3267_v56, %v4673_v9  ;;  %v2311_v19 = vpop.f32.mrb[103].mxu0 }
 0x6ad   :  { %v2454_v22 = vadd.f32 %v4673_v9, %v2311_v19 }
 0x6ae   :  { %2487 = vst [vmem:[#allocation10 + $0x38] sm:$0xff] %v2455_v27 }
 0x6af   :  { %2486 = vst [vmem:[#allocation10 + $0x30] sm:$0xff] %v2454_v22 }
 0x6b3   :  { %v3270_v30 = vpop.f32.mrb[104].mxu0 }
 0x6b4   :  { %v2457_v32 = vadd.f32 %v3270_v30, %v4673_v9  ;;  %v2321_v33 = vpop.f32.mrb[105].mxu0 }
 0x6b5   :  { %v2456_v35 = vadd.f32 %v4673_v9, %v2321_v33 }
 0x6b6   :  { %2489 = vst [vmem:[#allocation10 + $0x48] sm:$0xff] %v2457_v32 }
 0x6b7   :  { %2488 = vst [vmem:[#allocation10 + $0x40] sm:$0xff] %v2456_v35 }
 0x6bb   :  { %v3273_v39 = vpop.f32.mrb[106].mxu0 }
 0x6bc   :  { %v2459_v41 = vadd.f32 %v3273_v39, %v4673_v9  ;;  %v2331_v49 = vpop.f32.mrb[107].mxu0 }
 0x6bd   :  { %v2458_v52 = vadd.f32 %v4673_v9, %v2331_v49 }
 0x6be   :  { %2491 = vst [vmem:[#allocation10 + $0x58] sm:$0xff] %v2459_v41 }
 0x6bf   :  { %2490 = vst [vmem:[#allocation10 + $0x50] sm:$0xff] %v2458_v52 }
 0x6c3   :  { %v3276_v57 = vpop.f32.mrb[108].mxu0 }
 0x6c4   :  { %v2461_v58 = vadd.f32 %v3276_v57, %v4673_v9  ;;  %v2341_v61 = vpop.f32.mrb[109].mxu0 }
 0x6c5   :  { %v2460_v4 = vadd.f32 %v4673_v9, %v2341_v61 }
 0x6c6   :  { %2493 = vst [vmem:[#allocation10 + $0x68] sm:$0xff] %v2461_v58 }
 0x6c7   :  { %2492 = vst [vmem:[#allocation10 + $0x60] sm:$0xff] %v2460_v4 }
 0x6cb   :  { %v3279_v6 = vpop.f32.mrb[110].mxu0 }
 0x6cc   :  { %v2463_v40 = vadd.f32 %v3279_v6, %v4673_v9  ;;  %v2351_v10 = vpop.f32.mrb[111].mxu0 }
 0x6cd   :  { %v2462_v11 = vadd.f32 %v4673_v9, %v2351_v10 }
 0x6ce   :  { %2495 = vst [vmem:[#allocation10 + $0x78] sm:$0xff] %v2463_v40 }
 0x6cf   :  { %2494 = vst [vmem:[#allocation10 + $0x70] sm:$0xff] %v2462_v11 }
 0x6d3   :  { %v3282_v17 = vpop.f32.mrb[112].mxu0 }
 0x6d4   :  { %v2465_v24 = vadd.f32 %v3282_v17, %v4673_v9  ;;  %v2361_v34 = vpop.f32.mrb[113].mxu0 }
 0x6d5   :  { %v2464_v31 = vadd.f32 %v4673_v9, %v2361_v34 }
 0x6d6   :  { %2497 = vst [vmem:[#allocation10 + $0x88] sm:$0xff] %v2465_v24 }
 0x6d7   :  { %2496 = vst [vmem:[#allocation10 + $0x80] sm:$0xff] %v2464_v31 }
 0x6db   :  { %v3285_v15 = vpop.f32.mrb[114].mxu0 }
 0x6dc   :  { %v2467_v3 = vadd.f32 %v3285_v15, %v4673_v9  ;;  %v2371_v42 = vpop.f32.mrb[115].mxu0 }
 0x6dd   :  { %v2466_v16 = vadd.f32 %v4673_v9, %v2371_v42 }
 0x6de   :  { %2499 = vst [vmem:[#allocation10 + $0x98] sm:$0xff] %v2467_v3 }
 0x6df   :  { %2498 = vst [vmem:[#allocation10 + $0x90] sm:$0xff] %v2466_v16 }
 0x6e3   :  { %v3288_v43 = vpop.f32.mrb[116].mxu0 }
 0x6e4   :  { %v2469_v47 = vadd.f32 %v3288_v43, %v4673_v9  ;;  %v2381_v48 = vpop.f32.mrb[117].mxu0 }
 0x6e5   :  { %v2468_v2 = vadd.f32 %v4673_v9, %v2381_v48 }
 0x6e6   :  { %2501 = vst [vmem:[#allocation10 + $0xa8] sm:$0xff] %v2469_v47 }
 0x6e7   :  { %2500 = vst [vmem:[#allocation10 + $0xa0] sm:$0xff] %v2468_v2 }
 0x6eb   :  { %v3291_v29 = vpop.f32.mrb[118].mxu0 }
 0x6ec   :  { %v2471_v46 = vadd.f32 %v3291_v29, %v4673_v9  ;;  %v2391_v12 = vpop.f32.mrb[119].mxu0 }
 0x6ed   :  { %v2470_v36 = vadd.f32 %v4673_v9, %v2391_v12 }
 0x6ee   :  { %2503 = vst [vmem:[#allocation10 + $0xb8] sm:$0xff] %v2471_v46 }
 0x6ef   :  { %2502 = vst [vmem:[#allocation10 + $0xb0] sm:$0xff] %v2470_v36 }
 0x6f3   :  { %v3294_v7 = vpop.f32.mrb[120].mxu0 }
 0x6f4   :  { %v2407_v0 = vadd.f32 %v3294_v7, %v4654_v50  ;;  %v2401_v45 = vpop.f32.mrb[121].mxu0 }
 0x6f5   :  { %v2402_v54 = vadd.f32 %v2401_v45, %v4656_v53 }
 0x6f6   :  { %v2473_v44 = vadd.f32 %v4673_v9, %v2407_v0 }
 0x6f7   :  { %v2472_v18 = vadd.f32 %v4673_v9, %v2402_v54 }
 0x6f8   :  { %2505 = vst [vmem:[#allocation10 + $0xc8] sm:$0xff] %v2473_v44 }
 0x6f9   :  { %2504 = vst [vmem:[#allocation10 + $0xc0] sm:$0xff] %v2472_v18 }
 0x6fb   :  { %v3297_v37 = vpop.f32.mrb[122].mxu0 }
 0x6fc   :  { %v2417_v5 = vadd.f32 %v3297_v37, %v4658_v51  ;;  %v2411_v28 = vpop.f32.mrb[123].mxu0 }
 0x6fd   :  { %v2412_v8 = vadd.f32 %v2411_v28, %v4660_v55 }
 0x6fe   :  { %v2475_v14 = vadd.f32 %v4673_v9, %v2417_v5 }
 0x6ff   :  { %v2474_v20 = vadd.f32 %v4673_v9, %v2412_v8 }
 0x700   :  { %2507 = vst [vmem:[#allocation10 + $0xd8] sm:$0xff] %v2475_v14 }
 0x701   :  { %2506 = vst [vmem:[#allocation10 + $0xd0] sm:$0xff] %v2474_v20 }
 0x703   :  { %v3300_v50 = vpop.f32.mrb[124].mxu0 }
 0x704   :  { %v2427_v53 = vadd.f32 %v3300_v50, %v4662_v60  ;;  %v2421_v21 = vpop.f32.mrb[125].mxu0 }
 0x705   :  { %v2422_v23 = vadd.f32 %v2421_v21, %v4664_v62 }
 0x706   :  { %v2477_v59 = vadd.f32 %v4673_v9, %v2427_v53 }
 0x707   :  { %v2476_v38 = vadd.f32 %v4673_v9, %v2422_v23 }
 0x708   :  { %2509 = vst [vmem:[#allocation10 + $0xe8] sm:$0xff] %v2477_v59 }
 0x709   :  { %2508 = vst [vmem:[#allocation10 + $0xe0] sm:$0xff] %v2476_v38 }
 0x70b   :  { %v3303_v51 = vpop.f32.mrb[126].mxu0 }
 0x70c   :  { %v2437_v55 = vadd.f32 %v3303_v51, %v4666_v63  ;;  %v2431_v26 = vpop.f32.mrb[127].mxu0 }
 0x70d   :  { %v2432_v13 = vadd.f32 %v2431_v26, %v4668_v1 }
 0x70e   :  { %v2479_v25 = vadd.f32 %v4673_v9, %v2437_v55 }
 0x70f   :  { %v2478_v60 = vadd.f32 %v4673_v9, %v2432_v13 }
 0x710   :  { %2511 = vst [vmem:[#allocation10 + $0xf8] sm:$0xff] %v2479_v25 }
 0x711   :  { %2510 = vst [vmem:[#allocation10 + $0xf0] sm:$0xff] %v2478_v60 }
 0x712   :  { %3925 = shalt.err (!%p3922_p8)
}
 0x713   :  { %s3926_s27 = scalar_lea.hbm %s4735_s5, 4096 }
 0x714   :  { %p3927_p9 = scmp.ne.s32.totalorder %s4735_s5, %s3926_s27  ;;  %p3930_p10 = scmp.lt.u32.totalorder %s3926_s27, %s4735_s5 }
 0x716   :  { %p3932_p11 = pnand %p3930_p10, %p3927_p9 }
 0x718   :  { %3935 = shalt.err (!%p3932_p11)
}
 0x719   :  { %2523 = dma.vmem_to_hbm [thread:$0]  %s2518_s23, 4096, %s4735_s5, [#allocation4], %s3945_s28, %s3945_s28, %s3946_s29  }
 0x71a   :  { %3942 = dma.done.wait [#allocation4], 4096  }
 0x71b   :  { %3943 = vsyncadd [#allocation4], 4294963200 }
 0x71c   :  { %2527 = vsyncpa [#allocation3], 1 }
 0x71d   :  { %2528 = vsyncpa [#allocation6], 1 }
 0x71e   :  { %2529 = vsyncpa [#allocation9], 1 }
 0x71f   :  { %2530 = vsyncpa [#allocation4], 1 }

</bundles_post_ra>
